<compile_context>
chip_gen: v6e
topology: v6e:2x2x1
jax: 0.10.0
libtpu: 0.0.40
codegen_flags: <defaults>
</compile_context>

<pallas_src>
import functools

import jax
import jax.numpy as jnp
from jax.experimental import pallas as pl
from jax.experimental.pallas import tpu as pltpu

LANE = 128  # FC hidden/output dims are lane-padded to 128 for lane-dense stores


def _round_up(x, m):
    return ((x + m - 1) // m) * m


# ---------------------------------------------------------------------------
# Kernel 1: fused conv (im2col matmul) + folded BatchNorm + ReLU + 2x2 maxpool
#   patches block : [4, TM, K]     (4 pool offsets, M-tiled, bf16)
#   weights       : [K, Cpad]      (bf16, compact-padded Cout, VMEM-resident)
#   scale/shift   : [1, Cpad]      (f32, folded BN(eval) + conv bias, resident)
#   output block  : [TM, Cpad]     (bf16)
# ---------------------------------------------------------------------------
def _conv_bn_relu_pool_kernel(p_ref, w_ref, scale_ref, shift_ref, o_ref):
    w = w_ref[...]                      # resident across grid steps
    z0 = jnp.dot(p_ref[0], w, preferred_element_type=jnp.float32)
    z1 = jnp.dot(p_ref[1], w, preferred_element_type=jnp.float32)
    z2 = jnp.dot(p_ref[2], w, preferred_element_type=jnp.float32)
    z3 = jnp.dot(p_ref[3], w, preferred_element_type=jnp.float32)
    zmax = jnp.maximum(jnp.maximum(z0, z1), jnp.maximum(z2, z3))
    zmin = jnp.minimum(jnp.minimum(z0, z1), jnp.minimum(z2, z3))
    scale = scale_ref[...]
    shift = shift_ref[...]
    # Affine hoisted out of the 4 branches; maximum(zmax*s, zmin*s) is correct
    # for either sign of the per-channel folded-BN scale.
    y = jnp.maximum(zmax * scale, zmin * scale) + shift
    o_ref[...] = jnp.maximum(y, 0.0).astype(o_ref.dtype)   # ReLU commutes with max


def conv_bn_relu_pool(patches4, w, scale, shift, *, tm_max=2048):
    """patches4: [4, M, K] bf16; returns [M, Cpad] bf16 (Cpad = w.shape[1])."""
    _, M, K = patches4.shape
    N = w.shape[1]
    if M <= 256 and M <= tm_max:
        TM = M                                           # single full-extent block
    else:
        # big tiles (amortize ~0.35us/step), 256-aligned, and >= 2 grid steps so
        # the "parallel" axis shards across both v7x TensorCores.
        TM = min(tm_max, _round_up(-(-M // 2), 256))

    return pl.pallas_call(
        _conv_bn_relu_pool_kernel,
        out_shape=jax.ShapeDtypeStruct((M, N), jnp.bfloat16),
        grid=(pl.cdiv(M, TM),),                          # ragged tail handled by Pallas
        in_specs=[
            pl.BlockSpec((4, TM, K), lambda i: (0, i, 0)),   # streamed patch tiles
            pl.BlockSpec((K, N), lambda i: (0, 0)),          # resident weights
            pl.BlockSpec((1, N), lambda i: (0, 0)),          # resident BN scale
            pl.BlockSpec((1, N), lambda i: (0, 0)),          # resident BN shift
        ],
        out_specs=pl.BlockSpec((TM, N), lambda i: (i, 0)),
        compiler_params=pltpu.CompilerParams(
            dimension_semantics=("parallel",)),              # 2-TC sharding on v7x
    )(patches4, w, scale, shift)


# ---------------------------------------------------------------------------
# Kernel 2: fused 3-layer MLP head (Linear -> Linear -> Linear), batch-tiled,
#           bf16 weights/activations (f32 accumulate), resident weights.
# ---------------------------------------------------------------------------
def _fc3_kernel(x_ref, w1_ref, b1_ref, w2_ref, b2_ref, w3_ref, b3_ref, o_ref):
    h = jnp.dot(x_ref[...], w1_ref[...], preferred_element_type=jnp.float32) + b1_ref[...]
    h = jnp.dot(h.astype(jnp.bfloat16), w2_ref[...],
                preferred_element_type=jnp.float32) + b2_ref[...]
    o_ref[...] = (jnp.dot(h.astype(jnp.bfloat16), w3_ref[...],
                          preferred_element_type=jnp.float32)
                  + b3_ref[...]).astype(o_ref.dtype)


def fc3(x, w1, b1, w2, b2, w3, b3):
    B, D0 = x.shape
    D1, D2, D3 = w1.shape[1], w2.shape[1], w3.shape[1]
    TB = min(128, _round_up(B, 8))                  # sublane-full batch tiles
    if B > 8:                                       # >= 2 grid steps when possible
        TB = min(TB, _round_up(-(-B // 2), 8))
    Bp = _round_up(B, TB)
    if Bp != B:
        x = jnp.pad(x, ((0, Bp - B), (0, 0)))

    out = pl.pallas_call(
        _fc3_kernel,
        out_shape=jax.ShapeDtypeStruct((Bp, D3), jnp.float32),
        grid=(Bp // TB,),
        in_specs=[
            pl.BlockSpec((TB, D0), lambda i: (i, 0)),        # streamed activations
            pl.BlockSpec((D0, D1), lambda i: (0, 0)),        # resident weights/biases
            pl.BlockSpec((1, D1), lambda i: (0, 0)),
            pl.BlockSpec((D1, D2), lambda i: (0, 0)),
            pl.BlockSpec((1, D2), lambda i: (0, 0)),
            pl.BlockSpec((D2, D3), lambda i: (0, 0)),
            pl.BlockSpec((1, D3), lambda i: (0, 0)),
        ],
        out_specs=pl.BlockSpec((TB, D3), lambda i: (i, 0)),
        compiler_params=pltpu.CompilerParams(
            dimension_semantics=("parallel",)),
    )(x, w1, b1, w2, b2, w3, b3)
    return out[:B]


# ---------------------------------------------------------------------------
# Glue: im2col + split into the four 2x2-maxpool offsets, stacked [4, M, K]
# (pure data movement in XLA, in bf16; K flattening order is (kh, kw, cin))
# ---------------------------------------------------------------------------
def _pool_offset_patches(x_nhwc, ksize):
    B, H, W, C = x_nhwc.shape
    OH, OW = H - ksize + 1, W - ksize + 1
    cols = [x_nhwc[:, kh:kh + OH, kw:kw + OW, :]
            for kh in range(ksize) for kw in range(ksize)]
    patches = jnp.concatenate(cols, axis=-1)                 # [B, OH, OW, k*k*C]
    PH, PW = OH // 2, OW // 2
    offs = [patches[:, di:di + 2 * PH:2, dj:dj + 2 * PW:2, :].reshape(B * PH * PW, -1)
            for di in range(2) for dj in range(2)]
    return jnp.stack(offs, axis=0), (PH, PW)                 # [4, M, K]


# ---------------------------------------------------------------------------
# Parameters (deterministic, shapes from MyLeNet5_seq.__init__).
# ---------------------------------------------------------------------------
def init_params(key, num_classes=10):
    ks = jax.random.split(key, 18)
    nrm = lambda k, s, sc=0.1: (jax.random.normal(k, s) * sc).astype(jnp.float32)
    eps = 1e-5

    def conv_block(kw, kb, kg, kbe, krm, krv, cout, cin, ksz, cpad):
        w = nrm(kw, (cout, cin, ksz, ksz))            # PyTorch layout [Cout,Cin,KH,KW]
        b = nrm(kb, (cout,))
        gamma = 1.0 + nrm(kg, (cout,))
        beta = nrm(kbe, (cout,))
        rmean = nrm(krm, (cout,))
        rvar = 1.0 + jnp.abs(nrm(krv, (cout,)))
        scale = gamma / jnp.sqrt(rvar + eps)
        shift = beta + scale * (b - rmean)            # fold conv bias + BN(eval)
        w_mat = jnp.transpose(w, (2, 3, 1, 0)).reshape(ksz * ksz * cin, cout)
        w_mat = jnp.pad(w_mat, ((0, 0), (0, cpad - cout))).astype(jnp.bfloat16)
        scale = jnp.pad(scale, (0, cpad - cout)).reshape(1, cpad)
        shift = jnp.pad(shift, (0, cpad - cout)).reshape(1, cpad)
        return w_mat, scale, shift

    w1, s1, t1 = conv_block(*ks[0:6], cout=6, cin=3, ksz=5, cpad=8)
    w2, s2, t2 = conv_block(*ks[6:12], cout=16, cin=6, ksz=5, cpad=16)

    # fc1: compact contraction dim (16 real conv2 channels).  NHWC (5,5,16)
    # flatten -> PyTorch NCHW (16,5,5) flatten permutation baked into the rows,
    # K padded 400 -> 512, hidden lane-padded to 128.  bf16 weights, f32 bias.
    fw1_raw = nrm(ks[12], (120, 16 * 5 * 5))          # PyTorch layout [out, in]
    fb1_raw = nrm(ks[13], (120,))
    fw1_t = jnp.transpose(fw1_raw)                    # [400, 120]
    hh, ww, cc = jnp.meshgrid(jnp.arange(5), jnp.arange(5), jnp.arange(16),
                              indexing="ij")
    dst = (hh * (5 * 16) + ww * 16 + cc).reshape(-1)  # our flatten index (h,w,c)
    src = (cc * 25 + hh * 5 + ww).reshape(-1)         # PyTorch flatten index (c,h,w)
    fw1 = jnp.zeros((512, LANE), jnp.float32).at[dst, :120].set(fw1_t[src])
    fw1 = fw1.astype(jnp.bfloat16)
    fb1 = jnp.zeros((1, LANE), jnp.float32).at[0, :120].set(fb1_raw)

    def linear(kw, kb, din, dout):
        w = nrm(kw, (dout, din))                      # PyTorch layout [out, in]
        b = nrm(kb, (dout,))
        w_p = jnp.zeros((LANE, LANE), jnp.float32).at[:din, :dout].set(jnp.transpose(w))
        b_p = jnp.zeros((1, LANE), jnp.float32).at[0, :dout].set(b)
        return w_p.astype(jnp.bfloat16), b_p

    fw2, fb2 = linear(ks[14], ks[15], 120, 84)
    fw3, fb3 = linear(ks[16], ks[17], 84, num_classes)

    return dict(w1=w1, s1=s1, t1=t1, w2=w2, s2=s2, t2=t2,
                fw1=fw1, fb1=fb1, fw2=fw2, fb2=fb2, fw3=fw3, fb3=fb3)


# ---------------------------------------------------------------------------
# Forward pass (matches MyLeNet5_seq.forward; fc_seq has no activations)
# ---------------------------------------------------------------------------
@functools.partial(jax.jit, static_argnames="num_classes")
def lenet5_forward(x_nchw, params, num_classes=10):
    B = x_nchw.shape[0]
    # NCHW -> NHWC and straight to bf16: halves all downstream im2col HBM bytes.
    x = jnp.transpose(x_nchw, (0, 2, 3, 1)).astype(jnp.bfloat16)

    # conv_seq1: Conv2d(3->6,k5) + BN + ReLU + MaxPool2x2   (32 -> 28 -> 14)
    p4, (ph, pw) = _pool_offset_patches(x, 5)
    y1 = conv_bn_relu_pool(p4, params["w1"], params["s1"], params["t1"])
    x1 = y1.reshape(B, ph, pw, y1.shape[-1])[..., :6]        # compact 6 real channels

    # conv_seq2: Conv2d(6->16,k5) + BN + ReLU + MaxPool2x2  (14 -> 10 -> 5)
    p4, (ph, pw) = _pool_offset_patches(x1, 5)
    y2 = conv_bn_relu_pool(p4, params["w2"], params["s2"], params["t2"])

    # flatten compact (h, w, c) order; the PyTorch NCHW flatten permutation and
    # the 400 -> 512 contraction pad are baked into fw1.  Keep bf16.
    flat = y2.reshape(B, ph * pw * y2.shape[-1])
    flat = jnp.pad(flat, ((0, 0), (0, params["fw1"].shape[0] - flat.shape[1])))

    # fc_seq: Linear(400,120) -> Linear(120,84) -> Linear(84,num_classes)
    logits = fc3(flat, params["fw1"], params["fb1"],
                 params["fw2"], params["fb2"], params["fw3"], params["fb3"])
    return logits[:, :num_classes]


if __name__ == "__main__":
    key = jax.random.PRNGKey(0)
    kx, kp = jax.random.split(key)
    # LeNet-5 for CIFAR-10 requires 3x32x32 input (flatten size 16*5*5); batch=2.
    x = jax.random.normal(kx, (2, 3, 32, 32), dtype=jnp.float32)
    params = init_params(kp, num_classes=10)

    logits = lenet5_forward(x, params, num_classes=10)
    jax.block_until_ready(logits)
    assert logits.shape == (2, 10) and logits.dtype == jnp.float32
    print("KERNEL_OK")
</pallas_src>

<mosaic_0001>
module attributes {stable_mosaic.version = 11 : i64} {
  func.func @_conv_bn_relu_pool_kernel(%arg0: i32, %arg1: memref<4x256x75xbf16, #tpu.memory_space<vmem>>, %arg2: memref<75x8xbf16, #tpu.memory_space<vmem>>, %arg3: memref<1x8xf32, #tpu.memory_space<vmem>>, %arg4: memref<1x8xf32, #tpu.memory_space<vmem>>, %arg5: memref<256x8xbf16, #tpu.memory_space<vmem>>) attributes {dimension_semantics = [#tpu.dimension_semantics<parallel>], iteration_bounds = array<i64: 2>, scalar_prefetch = 0 : i64, scratch_operands = 0 : i64, tpu.core_type = #tpu.core_type<tc>, window_params = [{transform_indices = @transform_0, window_bounds = array<i64: 4, 256, 75>}, {pipeline_mode = #tpu.pipeline_mode<synchronous>, transform_indices = @transform_1, window_bounds = array<i64: 75, 8>}, {pipeline_mode = #tpu.pipeline_mode<synchronous>, transform_indices = @transform_2, window_bounds = array<i64: 1, 8>}, {pipeline_mode = #tpu.pipeline_mode<synchronous>, transform_indices = @transform_3, window_bounds = array<i64: 1, 8>}, {transform_indices = @transform_4, window_bounds = array<i64: 256, 8>}]} {
    %c0 = arith.constant 0 : index
    %c0_0 = arith.constant 0 : index
    %0 = vector.load %arg2[%c0, %c0_0] : memref<75x8xbf16, #tpu.memory_space<vmem>>, vector<75x8xbf16>
    %c0_1 = arith.constant 0 : index
    %c0_2 = arith.constant 0 : index
    %c0_3 = arith.constant 0 : index
    %1 = vector.load %arg1[%c0_1, %c0_2, %c0_3] : memref<4x256x75xbf16, #tpu.memory_space<vmem>>, vector<1x256x75xbf16>
    %2 = vector.shape_cast %1 : vector<1x256x75xbf16> to vector<256x75xbf16>
    %cst = arith.constant dense<0.000000e+00> : vector<256x8xf32>
    %3 = tpu.matmul %2, %0, %cst {dimension_numbers = #tpu.dot_dimension_numbers<[1], [0], [0], [1], [0, 0, 1, 1], [], []>} : vector<256x75xbf16>, vector<75x8xbf16>, vector<256x8xf32> -> vector<256x8xf32>
    %c1 = arith.constant 1 : index
    %c0_4 = arith.constant 0 : index
    %c0_5 = arith.constant 0 : index
    %4 = vector.load %arg1[%c1, %c0_4, %c0_5] : memref<4x256x75xbf16, #tpu.memory_space<vmem>>, vector<1x256x75xbf16>
    %5 = vector.shape_cast %4 : vector<1x256x75xbf16> to vector<256x75xbf16>
    %cst_6 = arith.constant dense<0.000000e+00> : vector<256x8xf32>
    %6 = tpu.matmul %5, %0, %cst_6 {dimension_numbers = #tpu.dot_dimension_numbers<[1], [0], [0], [1], [0, 0, 1, 1], [], []>} : vector<256x75xbf16>, vector<75x8xbf16>, vector<256x8xf32> -> vector<256x8xf32>
    %c2 = arith.constant 2 : index
    %c0_7 = arith.constant 0 : index
    %c0_8 = arith.constant 0 : index
    %7 = vector.load %arg1[%c2, %c0_7, %c0_8] : memref<4x256x75xbf16, #tpu.memory_space<vmem>>, vector<1x256x75xbf16>
    %8 = vector.shape_cast %7 : vector<1x256x75xbf16> to vector<256x75xbf16>
    %cst_9 = arith.constant dense<0.000000e+00> : vector<256x8xf32>
    %9 = tpu.matmul %8, %0, %cst_9 {dimension_numbers = #tpu.dot_dimension_numbers<[1], [0], [0], [1], [0, 0, 1, 1], [], []>} : vector<256x75xbf16>, vector<75x8xbf16>, vector<256x8xf32> -> vector<256x8xf32>
    %c3 = arith.constant 3 : index
    %c0_10 = arith.constant 0 : index
    %c0_11 = arith.constant 0 : index
    %10 = vector.load %arg1[%c3, %c0_10, %c0_11] : memref<4x256x75xbf16, #tpu.memory_space<vmem>>, vector<1x256x75xbf16>
    %11 = vector.shape_cast %10 : vector<1x256x75xbf16> to vector<256x75xbf16>
    %cst_12 = arith.constant dense<0.000000e+00> : vector<256x8xf32>
    %12 = tpu.matmul %11, %0, %cst_12 {dimension_numbers = #tpu.dot_dimension_numbers<[1], [0], [0], [1], [0, 0, 1, 1], [], []>} : vector<256x75xbf16>, vector<75x8xbf16>, vector<256x8xf32> -> vector<256x8xf32>
    %13 = arith.maximumf %3, %6 : vector<256x8xf32>
    %14 = arith.maximumf %9, %12 : vector<256x8xf32>
    %15 = arith.maximumf %13, %14 : vector<256x8xf32>
    %16 = arith.minimumf %3, %6 : vector<256x8xf32>
    %17 = arith.minimumf %9, %12 : vector<256x8xf32>
    %18 = arith.minimumf %16, %17 : vector<256x8xf32>
    %c0_13 = arith.constant 0 : index
    %c0_14 = arith.constant 0 : index
    %19 = vector.load %arg3[%c0_13, %c0_14] : memref<1x8xf32, #tpu.memory_space<vmem>>, vector<1x8xf32>
    %c0_15 = arith.constant 0 : index
    %c0_16 = arith.constant 0 : index
    %20 = vector.load %arg4[%c0_15, %c0_16] : memref<1x8xf32, #tpu.memory_space<vmem>>, vector<1x8xf32>
    %21 = vector.broadcast %19 : vector<1x8xf32> to vector<256x8xf32>
    %22 = arith.mulf %15, %21 : vector<256x8xf32>
    %23 = vector.broadcast %19 : vector<1x8xf32> to vector<256x8xf32>
    %24 = arith.mulf %18, %23 : vector<256x8xf32>
    %25 = arith.maximumf %22, %24 : vector<256x8xf32>
    %26 = vector.broadcast %20 : vector<1x8xf32> to vector<256x8xf32>
    %27 = arith.addf %25, %26 : vector<256x8xf32>
    %cst_17 = arith.constant 0.000000e+00 : f32
    %28 = vector.broadcast %cst_17 : f32 to vector<256x8xf32>
    %29 = arith.maximumf %27, %28 : vector<256x8xf32>
    %30 = arith.truncf %29 : vector<256x8xf32> to vector<256x8xbf16>
    %c0_18 = arith.constant 0 : index
    %c0_19 = arith.constant 0 : index
    %31 = vector.load %arg5[%c0_18, %c0_19] : memref<256x8xbf16, #tpu.memory_space<vmem>>, vector<256x8xbf16>
    tpu.vector_store %arg5[%c0_18, %c0_19], %30 {strides = array<i32>} : memref<256x8xbf16, #tpu.memory_space<vmem>>, vector<256x8xbf16>,
    return
  }
  func.func @transform_0(%arg0: i32) -> (i32, i32, i32) {
    %c0_i32 = arith.constant 0 : i32
    %c0_i32_0 = arith.constant 0 : i32
    %c0_i32_1 = arith.constant 0 : i32
    return %c0_i32, %arg0, %c0_i32_0 : i32, i32, i32
  }
  func.func @transform_1(%arg0: i32) -> (i32, i32) {
    %c0_i32 = arith.constant 0 : i32
    %c0_i32_0 = arith.constant 0 : i32
    %c0_i32_1 = arith.constant 0 : i32
    return %c0_i32, %c0_i32_0 : i32, i32
  }
  func.func @transform_2(%arg0: i32) -> (i32, i32) {
    %c0_i32 = arith.constant 0 : i32
    %c0_i32_0 = arith.constant 0 : i32
    %c0_i32_1 = arith.constant 0 : i32
    return %c0_i32, %c0_i32_0 : i32, i32
  }
  func.func @transform_3(%arg0: i32) -> (i32, i32) {
    %c0_i32 = arith.constant 0 : i32
    %c0_i32_0 = arith.constant 0 : i32
    %c0_i32_1 = arith.constant 0 : i32
    return %c0_i32, %c0_i32_0 : i32, i32
  }
  func.func @transform_4(%arg0: i32) -> (i32, i32) {
    %c0_i32 = arith.constant 0 : i32
    %c0_i32_0 = arith.constant 0 : i32
    return %arg0, %c0_i32 : i32, i32
  }
}

module attributes {stable_mosaic.version = 11 : i64} {
  func.func @_conv_bn_relu_pool_kernel(%arg0: i32, %arg1: memref<4x50x150xbf16, #tpu.memory_space<vmem>>, %arg2: memref<150x16xbf16, #tpu.memory_space<vmem>>, %arg3: memref<1x16xf32, #tpu.memory_space<vmem>>, %arg4: memref<1x16xf32, #tpu.memory_space<vmem>>, %arg5: memref<50x16xbf16, #tpu.memory_space<vmem>>) attributes {dimension_semantics = [#tpu.dimension_semantics<parallel>], iteration_bounds = array<i64: 1>, scalar_prefetch = 0 : i64, scratch_operands = 0 : i64, tpu.core_type = #tpu.core_type<tc>, window_params = [{transform_indices = @transform_0, window_bounds = array<i64: 4, 50, 150>}, {pipeline_mode = #tpu.pipeline_mode<synchronous>, transform_indices = @transform_1, window_bounds = array<i64: 150, 16>}, {pipeline_mode = #tpu.pipeline_mode<synchronous>, transform_indices = @transform_2, window_bounds = array<i64: 1, 16>}, {pipeline_mode = #tpu.pipeline_mode<synchronous>, transform_indices = @transform_3, window_bounds = array<i64: 1, 16>}, {transform_indices = @transform_4, window_bounds = array<i64: 50, 16>}]} {
    %c0 = arith.constant 0 : index
    %c0_0 = arith.constant 0 : index
    %0 = vector.load %arg2[%c0, %c0_0] : memref<150x16xbf16, #tpu.memory_space<vmem>>, vector<150x16xbf16>
    %c0_1 = arith.constant 0 : index
    %c0_2 = arith.constant 0 : index
    %c0_3 = arith.constant 0 : index
    %1 = vector.load %arg1[%c0_1, %c0_2, %c0_3] : memref<4x50x150xbf16, #tpu.memory_space<vmem>>, vector<1x50x150xbf16>
    %2 = vector.shape_cast %1 : vector<1x50x150xbf16> to vector<50x150xbf16>
    %cst = arith.constant dense<0.000000e+00> : vector<50x16xf32>
    %3 = tpu.matmul %2, %0, %cst {dimension_numbers = #tpu.dot_dimension_numbers<[1], [0], [0], [1], [0, 0, 1, 1], [], []>} : vector<50x150xbf16>, vector<150x16xbf16>, vector<50x16xf32> -> vector<50x16xf32>
    %c1 = arith.constant 1 : index
    %c0_4 = arith.constant 0 : index
    %c0_5 = arith.constant 0 : index
    %4 = vector.load %arg1[%c1, %c0_4, %c0_5] : memref<4x50x150xbf16, #tpu.memory_space<vmem>>, vector<1x50x150xbf16>
    %5 = vector.shape_cast %4 : vector<1x50x150xbf16> to vector<50x150xbf16>
    %cst_6 = arith.constant dense<0.000000e+00> : vector<50x16xf32>
    %6 = tpu.matmul %5, %0, %cst_6 {dimension_numbers = #tpu.dot_dimension_numbers<[1], [0], [0], [1], [0, 0, 1, 1], [], []>} : vector<50x150xbf16>, vector<150x16xbf16>, vector<50x16xf32> -> vector<50x16xf32>
    %c2 = arith.constant 2 : index
    %c0_7 = arith.constant 0 : index
    %c0_8 = arith.constant 0 : index
    %7 = vector.load %arg1[%c2, %c0_7, %c0_8] : memref<4x50x150xbf16, #tpu.memory_space<vmem>>, vector<1x50x150xbf16>
    %8 = vector.shape_cast %7 : vector<1x50x150xbf16> to vector<50x150xbf16>
    %cst_9 = arith.constant dense<0.000000e+00> : vector<50x16xf32>
    %9 = tpu.matmul %8, %0, %cst_9 {dimension_numbers = #tpu.dot_dimension_numbers<[1], [0], [0], [1], [0, 0, 1, 1], [], []>} : vector<50x150xbf16>, vector<150x16xbf16>, vector<50x16xf32> -> vector<50x16xf32>
    %c3 = arith.constant 3 : index
    %c0_10 = arith.constant 0 : index
    %c0_11 = arith.constant 0 : index
    %10 = vector.load %arg1[%c3, %c0_10, %c0_11] : memref<4x50x150xbf16, #tpu.memory_space<vmem>>, vector<1x50x150xbf16>
    %11 = vector.shape_cast %10 : vector<1x50x150xbf16> to vector<50x150xbf16>
    %cst_12 = arith.constant dense<0.000000e+00> : vector<50x16xf32>
    %12 = tpu.matmul %11, %0, %cst_12 {dimension_numbers = #tpu.dot_dimension_numbers<[1], [0], [0], [1], [0, 0, 1, 1], [], []>} : vector<50x150xbf16>, vector<150x16xbf16>, vector<50x16xf32> -> vector<50x16xf32>
    %13 = arith.maximumf %3, %6 : vector<50x16xf32>
    %14 = arith.maximumf %9, %12 : vector<50x16xf32>
    %15 = arith.maximumf %13, %14 : vector<50x16xf32>
    %16 = arith.minimumf %3, %6 : vector<50x16xf32>
    %17 = arith.minimumf %9, %12 : vector<50x16xf32>
    %18 = arith.minimumf %16, %17 : vector<50x16xf32>
    %c0_13 = arith.constant 0 : index
    %c0_14 = arith.constant 0 : index
    %19 = vector.load %arg3[%c0_13, %c0_14] : memref<1x16xf32, #tpu.memory_space<vmem>>, vector<1x16xf32>
    %c0_15 = arith.constant 0 : index
    %c0_16 = arith.constant 0 : index
    %20 = vector.load %arg4[%c0_15, %c0_16] : memref<1x16xf32, #tpu.memory_space<vmem>>, vector<1x16xf32>
    %21 = vector.broadcast %19 : vector<1x16xf32> to vector<50x16xf32>
    %22 = arith.mulf %15, %21 : vector<50x16xf32>
    %23 = vector.broadcast %19 : vector<1x16xf32> to vector<50x16xf32>
    %24 = arith.mulf %18, %23 : vector<50x16xf32>
    %25 = arith.maximumf %22, %24 : vector<50x16xf32>
    %26 = vector.broadcast %20 : vector<1x16xf32> to vector<50x16xf32>
    %27 = arith.addf %25, %26 : vector<50x16xf32>
    %cst_17 = arith.constant 0.000000e+00 : f32
    %28 = vector.broadcast %cst_17 : f32 to vector<50x16xf32>
    %29 = arith.maximumf %27, %28 : vector<50x16xf32>
    %30 = arith.truncf %29 : vector<50x16xf32> to vector<50x16xbf16>
    %c0_18 = arith.constant 0 : index
    %c0_19 = arith.constant 0 : index
    %31 = vector.load %arg5[%c0_18, %c0_19] : memref<50x16xbf16, #tpu.memory_space<vmem>>, vector<50x16xbf16>
    tpu.vector_store %arg5[%c0_18, %c0_19], %30 {strides = array<i32>} : memref<50x16xbf16, #tpu.memory_space<vmem>>, vector<50x16xbf16>,
    return
  }
  func.func @transform_0(%arg0: i32) -> (i32, i32, i32) {
    %c0_i32 = arith.constant 0 : i32
    %c0_i32_0 = arith.constant 0 : i32
    %c0_i32_1 = arith.constant 0 : i32
    return %c0_i32, %arg0, %c0_i32_0 : i32, i32, i32
  }
  func.func @transform_1(%arg0: i32) -> (i32, i32) {
    %c0_i32 = arith.constant 0 : i32
    %c0_i32_0 = arith.constant 0 : i32
    %c0_i32_1 = arith.constant 0 : i32
    return %c0_i32, %c0_i32_0 : i32, i32
  }
  func.func @transform_2(%arg0: i32) -> (i32, i32) {
    %c0_i32 = arith.constant 0 : i32
    %c0_i32_0 = arith.constant 0 : i32
    %c0_i32_1 = arith.constant 0 : i32
    return %c0_i32, %c0_i32_0 : i32, i32
  }
  func.func @transform_3(%arg0: i32) -> (i32, i32) {
    %c0_i32 = arith.constant 0 : i32
    %c0_i32_0 = arith.constant 0 : i32
    %c0_i32_1 = arith.constant 0 : i32
    return %c0_i32, %c0_i32_0 : i32, i32
  }
  func.func @transform_4(%arg0: i32) -> (i32, i32) {
    %c0_i32 = arith.constant 0 : i32
    %c0_i32_0 = arith.constant 0 : i32
    return %arg0, %c0_i32 : i32, i32
  }
}

module attributes {stable_mosaic.version = 11 : i64} {
  func.func @_fc3_kernel(%arg0: i32, %arg1: memref<8x512xbf16, #tpu.memory_space<vmem>>, %arg2: memref<512x128xbf16, #tpu.memory_space<vmem>>, %arg3: memref<1x128xf32, #tpu.memory_space<vmem>>, %arg4: memref<128x128xbf16, #tpu.memory_space<vmem>>, %arg5: memref<1x128xf32, #tpu.memory_space<vmem>>, %arg6: memref<128x128xbf16, #tpu.memory_space<vmem>>, %arg7: memref<1x128xf32, #tpu.memory_space<vmem>>, %arg8: memref<8x128xf32, #tpu.memory_space<vmem>>) attributes {dimension_semantics = [#tpu.dimension_semantics<parallel>], iteration_bounds = array<i64: 1>, scalar_prefetch = 0 : i64, scratch_operands = 0 : i64, tpu.core_type = #tpu.core_type<tc>, window_params = [{transform_indices = @transform_0, window_bounds = array<i64: 8, 512>}, {pipeline_mode = #tpu.pipeline_mode<synchronous>, transform_indices = @transform_1, window_bounds = array<i64: 512, 128>}, {pipeline_mode = #tpu.pipeline_mode<synchronous>, transform_indices = @transform_2, window_bounds = array<i64: 1, 128>}, {pipeline_mode = #tpu.pipeline_mode<synchronous>, transform_indices = @transform_3, window_bounds = array<i64: 128, 128>}, {pipeline_mode = #tpu.pipeline_mode<synchronous>, transform_indices = @transform_4, window_bounds = array<i64: 1, 128>}, {pipeline_mode = #tpu.pipeline_mode<synchronous>, transform_indices = @transform_5, window_bounds = array<i64: 128, 128>}, {pipeline_mode = #tpu.pipeline_mode<synchronous>, transform_indices = @transform_6, window_bounds = array<i64: 1, 128>}, {transform_indices = @transform_7, window_bounds = array<i64: 8, 128>}]} {
    %c0 = arith.constant 0 : index
    %c0_0 = arith.constant 0 : index
    %0 = vector.load %arg1[%c0, %c0_0] : memref<8x512xbf16, #tpu.memory_space<vmem>>, vector<8x512xbf16>
    %c0_1 = arith.constant 0 : index
    %c0_2 = arith.constant 0 : index
    %1 = vector.load %arg2[%c0_1, %c0_2] : memref<512x128xbf16, #tpu.memory_space<vmem>>, vector<512x128xbf16>
    %cst = arith.constant dense<0.000000e+00> : vector<8x128xf32>
    %2 = tpu.matmul %0, %1, %cst {dimension_numbers = #tpu.dot_dimension_numbers<[1], [0], [0], [1], [0, 0, 1, 1], [], []>} : vector<8x512xbf16>, vector<512x128xbf16>, vector<8x128xf32> -> vector<8x128xf32>
    %c0_3 = arith.constant 0 : index
    %c0_4 = arith.constant 0 : index
    %3 = vector.load %arg3[%c0_3, %c0_4] : memref<1x128xf32, #tpu.memory_space<vmem>>, vector<1x128xf32>
    %4 = vector.broadcast %3 : vector<1x128xf32> to vector<8x128xf32>
    %5 = arith.addf %2, %4 : vector<8x128xf32>
    %6 = arith.truncf %5 : vector<8x128xf32> to vector<8x128xbf16>
    %c0_5 = arith.constant 0 : index
    %c0_6 = arith.constant 0 : index
    %7 = vector.load %arg4[%c0_5, %c0_6] : memref<128x128xbf16, #tpu.memory_space<vmem>>, vector<128x128xbf16>
    %cst_7 = arith.constant dense<0.000000e+00> : vector<8x128xf32>
    %8 = tpu.matmul %6, %7, %cst_7 {dimension_numbers = #tpu.dot_dimension_numbers<[1], [0], [0], [1], [0, 0, 1, 1], [], []>} : vector<8x128xbf16>, vector<128x128xbf16>, vector<8x128xf32> -> vector<8x128xf32>
    %c0_8 = arith.constant 0 : index
    %c0_9 = arith.constant 0 : index
    %9 = vector.load %arg5[%c0_8, %c0_9] : memref<1x128xf32, #tpu.memory_space<vmem>>, vector<1x128xf32>
    %10 = vector.broadcast %9 : vector<1x128xf32> to vector<8x128xf32>
    %11 = arith.addf %8, %10 : vector<8x128xf32>
    %12 = arith.truncf %11 : vector<8x128xf32> to vector<8x128xbf16>
    %c0_10 = arith.constant 0 : index
    %c0_11 = arith.constant 0 : index
    %13 = vector.load %arg6[%c0_10, %c0_11] : memref<128x128xbf16, #tpu.memory_space<vmem>>, vector<128x128xbf16>
    %cst_12 = arith.constant dense<0.000000e+00> : vector<8x128xf32>
    %14 = tpu.matmul %12, %13, %cst_12 {dimension_numbers = #tpu.dot_dimension_numbers<[1], [0], [0], [1], [0, 0, 1, 1], [], []>} : vector<8x128xbf16>, vector<128x128xbf16>, vector<8x128xf32> -> vector<8x128xf32>
    %c0_13 = arith.constant 0 : index
    %c0_14 = arith.constant 0 : index
    %15 = vector.load %arg7[%c0_13, %c0_14] : memref<1x128xf32, #tpu.memory_space<vmem>>, vector<1x128xf32>
    %16 = vector.broadcast %15 : vector<1x128xf32> to vector<8x128xf32>
    %17 = arith.addf %14, %16 : vector<8x128xf32>
    %c0_15 = arith.constant 0 : index
    %c0_16 = arith.constant 0 : index
    %18 = vector.load %arg8[%c0_15, %c0_16] : memref<8x128xf32, #tpu.memory_space<vmem>>, vector<8x128xf32>
    tpu.vector_store %arg8[%c0_15, %c0_16], %17 {strides = array<i32>} : memref<8x128xf32, #tpu.memory_space<vmem>>, vector<8x128xf32>,
    return
  }
  func.func @transform_0(%arg0: i32) -> (i32, i32) {
    %c0_i32 = arith.constant 0 : i32
    %c0_i32_0 = arith.constant 0 : i32
    return %arg0, %c0_i32 : i32, i32
  }
  func.func @transform_1(%arg0: i32) -> (i32, i32) {
    %c0_i32 = arith.constant 0 : i32
    %c0_i32_0 = arith.constant 0 : i32
    %c0_i32_1 = arith.constant 0 : i32
    return %c0_i32, %c0_i32_0 : i32, i32
  }
  func.func @transform_2(%arg0: i32) -> (i32, i32) {
    %c0_i32 = arith.constant 0 : i32
    %c0_i32_0 = arith.constant 0 : i32
    %c0_i32_1 = arith.constant 0 : i32
    return %c0_i32, %c0_i32_0 : i32, i32
  }
  func.func @transform_3(%arg0: i32) -> (i32, i32) {
    %c0_i32 = arith.constant 0 : i32
    %c0_i32_0 = arith.constant 0 : i32
    %c0_i32_1 = arith.constant 0 : i32
    return %c0_i32, %c0_i32_0 : i32, i32
  }
  func.func @transform_4(%arg0: i32) -> (i32, i32) {
    %c0_i32 = arith.constant 0 : i32
    %c0_i32_0 = arith.constant 0 : i32
    %c0_i32_1 = arith.constant 0 : i32
    return %c0_i32, %c0_i32_0 : i32, i32
  }
  func.func @transform_5(%arg0: i32) -> (i32, i32) {
    %c0_i32 = arith.constant 0 : i32
    %c0_i32_0 = arith.constant 0 : i32
    %c0_i32_1 = arith.constant 0 : i32
    return %c0_i32, %c0_i32_0 : i32, i32
  }
  func.func @transform_6(%arg0: i32) -> (i32, i32) {
    %c0_i32 = arith.constant 0 : i32
    %c0_i32_0 = arith.constant 0 : i32
    %c0_i32_1 = arith.constant 0 : i32
    return %c0_i32, %c0_i32_0 : i32, i32
  }
  func.func @transform_7(%arg0: i32) -> (i32, i32) {
    %c0_i32 = arith.constant 0 : i32
    %c0_i32_0 = arith.constant 0 : i32
    return %arg0, %c0_i32 : i32, i32
  }
}

</mosaic_0001>

<bundles_post_ra>
// kernel: lenet5_forward.3
= control target key start
LH: loop header
LB: loop body
LE: loop exit
PB: predicated region body
PF: predicated region fallthrough
CT: control target
= control target key end

     0   :  { %s3875_s15 = smov 0   ;;  %s3877_s16 = smov 0   ;;  %s5097_s0 = inlined_call_operand.vmem [shape: bf16[4,392,75], index: 0, kind: input, shape index: {}]   ;;  %s5098_s1 = inlined_call_operand.vmem [shape: bf16[75,8], index: 1, kind: input, shape index: {}]   ;;  %s5099_s2 = inlined_call_operand.vmem [shape: f32[1,8], index: 2, kind: input, shape index: {}]   ;;  %s5100_s3 = inlined_call_operand.vmem [shape: f32[1,8], index: 3, kind: input, shape index: {}]   ;;  %s5101_s4 = inlined_call_operand.vmem [shape: bf16[392,8], index: 4, kind: output, shape index: {}]  }
   0x1   :  { %s3879_s17 = smov 0  }
   0x2 LB: > { %s3891_s18 = sadd.s32 4294967295, %s3783_s17   ;;  %s3894_s19 = sadd.s32 1, %s3783_s17   ;;  %s3783_s17 = sphi %s3879_s17, %s5253_s17   ;;  %s3779_s16 = sphi %s3877_s16, %s5252_s16   ;;  %s3775_s15 = sphi %s3875_s15, %s5251_s15  }
   0x3   : > { %s18_s20 = ssub.s32 %s3783_s17, %s3894_s19  ;;  %s21_s21 = sadd.s32 1, %s3779_s16 }
   0x4   : > { %p19_p0 = scmp.eq.s32.totalorder %s18_s20, 0  ;;  %p28_p1 = scmp.ne.s32.totalorder %s3779_s16, %s3775_s15 }
   0x5   : > { %p29_p2 = scmp.eq.s32.totalorder %s3783_s17, 0  ;;  %p121_p3 = scmp.eq.s32.totalorder %s3891_s18, 1 }
   0x6   : > { %s3904_s22 = scalar_select %p19_p0, %s3779_s16, %s21_s21  }
   0x7   : > { %p30_p4 = por %p29_p2, %p28_p1  ;;  %p3906_p5 = por %p121_p3, %p28_p1 }
   0x8   : > { %p2886_p6 = scmp.ge.s32.totalorder %s3783_s17, 2 }
   0xa   : > { %152 = sbr.rel (%p2886_p6) target bundleno = 105 (0x69), region = 28 }
   0xf   : > { %155 = sbr.rel (!%p30_p4) target bundleno = 105 (0x69), region = 32  ;;  %s157_s24 = sand.u32 (%p30_p4), 1, %s3779_s16  }
  0x10   : > { %s2888_s25 = sshll.u32 (%p30_p4), %s3783_s17, 5  ;;  %s2887_s26 = sshll.u32 (%p30_p4), %s157_s24, 9 }
  0x11   : > { %s161_s27 = ssub.s32 (%p30_p4), 49, %s2888_s25  ;;  %s3185_s28 = sshll.u32 (%p30_p4), %s3783_s17, 7 }
  0x12   : > { %p162_p7 = scmp.lt.s32.totalorder (%p30_p4), %s161_s27, 32  ;;  %s3919_s5 = scalar_lea.vmem (%p30_p4), %s5097_s0, %s3185_s28  }
  0x13   : > { %s3922_s7 = scalar_lea.vmem (%p30_p4), [#allocation2], %s2887_s26  }
  0x14   : > { %s5255_s27 = smov (!%p162_p7, %s161_s27), 32 }
  0x15   : > { %s2889_s6 = sshll.u32 %s5255_s27, 8 }
  0x16   : > { %p2892_p8 = scmp.eq.s32.totalorder %s2889_s6, 0 }
  0x17   : > { %s3925_s8 = sshrl.u32 (!%p2892_p8), %s5255_s27, 4 }
  0x18   : > { %170 = sbr.rel (%p2892_p8) target bundleno = 105 (0x69), region = 36  ;;  %p2893_p9 = scmp.le.s32.totalorder (!%p2892_p8), %s3925_s8, 0 }
  0x1d   : > { %2812 = sbr.rel (%p2893_p9) target bundleno = 84 (0x54), region = 200  ;;  %s5141_s9 = smov (!%p2893_p9), %s3922_s7 }
  0x1e   : > { %s5142_s10 = smov (!%p2893_p9), %s3919_s5  ;;  %s3934_s11 = smov (!%p2893_p9), 0  }
  0x1f   : > { %s3936_s12 = smov (!%p2893_p9), 0  }
  0x22 LB: >> { %v187_v0 = vld [vmem:[%s3791_s10] sm:$0xf]  ;;  %v189_v1 = vld [vmem:[%s3791_s10 + $0x4] sm:$0xf]  ;;  %v191_v2 = vld [vmem:[%s3791_s10 + $0x8] sm:$0xf]  ;;  %s3799_s12 = sphi %s3936_s12, %s181_s12   ;;  %s3795_s11 = sphi %s3934_s11, %s5143_s11   ;;  %s3791_s10 = sphi %s5142_s10, %s320_s10   ;;  %s3787_s9 = sphi %s5141_s9, %s321_s9  }
  0x23   : >> { %188 = vst [vmem:[%s3787_s9] sm:$0xf] %v187_v0  ;;  %190 = vst [vmem:[%s3787_s9 + $0x4] sm:$0xf] %v189_v1  ;;  %v193_v3 = vld [vmem:[%s3791_s10 + $0xc] sm:$0xf]  ;;  %s315_s13 = sadd.s32 1, %s3795_s11 }
  0x24   : >> { %192 = vst [vmem:[%s3787_s9 + $0x8] sm:$0xf] %v191_v2  ;;  %v195_v4 = vld [vmem:[%s3791_s10 + $0x10] sm:$0xf]  ;;  %v197_v5 = vld [vmem:[%s3791_s10 + $0x14] sm:$0xf]  ;;  %p316_p10 = scmp.ge.s32.totalorder %s315_s13, %s3925_s8 }
  0x25   : >> { %194 = vst [vmem:[%s3787_s9 + $0xc] sm:$0xf] %v193_v3  ;;  %196 = vst [vmem:[%s3787_s9 + $0x10] sm:$0xf] %v195_v4  ;;  %v199_v6 = vld [vmem:[%s3791_s10 + $0x18] sm:$0xf] }
  0x26   : >> { %198 = vst [vmem:[%s3787_s9 + $0x14] sm:$0xf] %v197_v5  ;;  %v201_v7 = vld [vmem:[%s3791_s10 + $0x1c] sm:$0xf]  ;;  %v203_v8 = vld [vmem:[%s3791_s10 + $0x20] sm:$0xf] }
  0x27   : >> { %200 = vst [vmem:[%s3787_s9 + $0x18] sm:$0xf] %v199_v6  ;;  %202 = vst [vmem:[%s3787_s9 + $0x1c] sm:$0xf] %v201_v7  ;;  %v205_v9 = vld [vmem:[%s3791_s10 + $0x24] sm:$0xf] }
  0x28   : >> { %204 = vst [vmem:[%s3787_s9 + $0x20] sm:$0xf] %v203_v8  ;;  %v207_v10 = vld [vmem:[%s3791_s10 + $0x28] sm:$0xf]  ;;  %v209_v11 = vld [vmem:[%s3791_s10 + $0x2c] sm:$0xf] }
  0x29   : >> { %206 = vst [vmem:[%s3787_s9 + $0x24] sm:$0xf] %v205_v9  ;;  %208 = vst [vmem:[%s3787_s9 + $0x28] sm:$0xf] %v207_v10  ;;  %v211_v12 = vld [vmem:[%s3791_s10 + $0x30] sm:$0xf] }
  0x2a   : >> { %210 = vst [vmem:[%s3787_s9 + $0x2c] sm:$0xf] %v209_v11  ;;  %v213_v13 = vld [vmem:[%s3791_s10 + $0x34] sm:$0xf]  ;;  %v215_v14 = vld [vmem:[%s3791_s10 + $0x38] sm:$0xf] }
  0x2b   : >> { %212 = vst [vmem:[%s3787_s9 + $0x30] sm:$0xf] %v211_v12  ;;  %214 = vst [vmem:[%s3787_s9 + $0x34] sm:$0xf] %v213_v13  ;;  %v217_v15 = vld [vmem:[%s3791_s10 + $0x3c] sm:$0xf] }
  0x2c   : >> { %216 = vst [vmem:[%s3787_s9 + $0x38] sm:$0xf] %v215_v14  ;;  %v219_v16 = vld [vmem:[%s3791_s10 + $0xc4] sm:$0xf]  ;;  %v221_v17 = vld [vmem:[%s3791_s10 + $0xc8] sm:$0xf] }
  0x2d   : >> { %218 = vst [vmem:[%s3787_s9 + $0x3c] sm:$0xf] %v217_v15  ;;  %220 = vst [vmem:[%s3787_s9 + $0x80] sm:$0xf] %v219_v16  ;;  %v223_v18 = vld [vmem:[%s3791_s10 + $0xcc] sm:$0xf] }
  0x2e   : >> { %222 = vst [vmem:[%s3787_s9 + $0x84] sm:$0xf] %v221_v17  ;;  %v225_v19 = vld [vmem:[%s3791_s10 + $0xd0] sm:$0xf]  ;;  %v227_v20 = vld [vmem:[%s3791_s10 + $0xd4] sm:$0xf] }
  0x2f   : >> { %224 = vst [vmem:[%s3787_s9 + $0x88] sm:$0xf] %v223_v18  ;;  %226 = vst [vmem:[%s3787_s9 + $0x8c] sm:$0xf] %v225_v19  ;;  %v229_v21 = vld [vmem:[%s3791_s10 + $0xd8] sm:$0xf] }
  0x30   : >> { %228 = vst [vmem:[%s3787_s9 + $0x90] sm:$0xf] %v227_v20  ;;  %v231_v22 = vld [vmem:[%s3791_s10 + $0xdc] sm:$0xf]  ;;  %v233_v23 = vld [vmem:[%s3791_s10 + $0xe0] sm:$0xf] }
  0x31   : >> { %230 = vst [vmem:[%s3787_s9 + $0x94] sm:$0xf] %v229_v21  ;;  %232 = vst [vmem:[%s3787_s9 + $0x98] sm:$0xf] %v231_v22  ;;  %v235_v24 = vld [vmem:[%s3791_s10 + $0xe4] sm:$0xf] }
  0x32   : >> { %234 = vst [vmem:[%s3787_s9 + $0x9c] sm:$0xf] %v233_v23  ;;  %v237_v25 = vld [vmem:[%s3791_s10 + $0xe8] sm:$0xf]  ;;  %v239_v26 = vld [vmem:[%s3791_s10 + $0xec] sm:$0xf] }
  0x33   : >> { %236 = vst [vmem:[%s3787_s9 + $0xa0] sm:$0xf] %v235_v24  ;;  %238 = vst [vmem:[%s3787_s9 + $0xa4] sm:$0xf] %v237_v25  ;;  %v241_v27 = vld [vmem:[%s3791_s10 + $0xf0] sm:$0xf] }
  0x34   : >> { %240 = vst [vmem:[%s3787_s9 + $0xa8] sm:$0xf] %v239_v26  ;;  %v243_v28 = vld [vmem:[%s3791_s10 + $0xf4] sm:$0xf]  ;;  %v245_v29 = vld [vmem:[%s3791_s10 + $0xf8] sm:$0xf] }
  0x35   : >> { %242 = vst [vmem:[%s3787_s9 + $0xac] sm:$0xf] %v241_v27  ;;  %244 = vst [vmem:[%s3787_s9 + $0xb0] sm:$0xf] %v243_v28  ;;  %v247_v30 = vld [vmem:[%s3791_s10 + $0xfc] sm:$0xf] }
  0x36   : >> { %246 = vst [vmem:[%s3787_s9 + $0xb4] sm:$0xf] %v245_v29  ;;  %v249_v31 = vld [vmem:[%s3791_s10 + $0x100] sm:$0xf]  ;;  %v251_v32 = vld [vmem:[%s3791_s10 + $0x188] sm:$0xf] }
  0x37   : >> { %248 = vst [vmem:[%s3787_s9 + $0xb8] sm:$0xf] %v247_v30  ;;  %250 = vst [vmem:[%s3787_s9 + $0xbc] sm:$0xf] %v249_v31  ;;  %v253_v33 = vld [vmem:[%s3791_s10 + $0x18c] sm:$0xf] }
  0x38   : >> { %252 = vst [vmem:[%s3787_s9 + $0x100] sm:$0xf] %v251_v32  ;;  %v255_v34 = vld [vmem:[%s3791_s10 + $0x190] sm:$0xf]  ;;  %v257_v35 = vld [vmem:[%s3791_s10 + $0x194] sm:$0xf] }
  0x39   : >> { %254 = vst [vmem:[%s3787_s9 + $0x104] sm:$0xf] %v253_v33  ;;  %256 = vst [vmem:[%s3787_s9 + $0x108] sm:$0xf] %v255_v34  ;;  %v259_v36 = vld [vmem:[%s3791_s10 + $0x198] sm:$0xf] }
  0x3a   : >> { %258 = vst [vmem:[%s3787_s9 + $0x10c] sm:$0xf] %v257_v35  ;;  %v261_v37 = vld [vmem:[%s3791_s10 + $0x19c] sm:$0xf]  ;;  %v263_v38 = vld [vmem:[%s3791_s10 + $0x1a0] sm:$0xf] }
  0x3b   : >> { %260 = vst [vmem:[%s3787_s9 + $0x110] sm:$0xf] %v259_v36  ;;  %262 = vst [vmem:[%s3787_s9 + $0x114] sm:$0xf] %v261_v37  ;;  %v265_v39 = vld [vmem:[%s3791_s10 + $0x1a4] sm:$0xf] }
  0x3c   : >> { %264 = vst [vmem:[%s3787_s9 + $0x118] sm:$0xf] %v263_v38  ;;  %v267_v40 = vld [vmem:[%s3791_s10 + $0x1a8] sm:$0xf]  ;;  %v269_v41 = vld [vmem:[%s3791_s10 + $0x1ac] sm:$0xf] }
  0x3d   : >> { %266 = vst [vmem:[%s3787_s9 + $0x11c] sm:$0xf] %v265_v39  ;;  %268 = vst [vmem:[%s3787_s9 + $0x120] sm:$0xf] %v267_v40  ;;  %v271_v42 = vld [vmem:[%s3791_s10 + $0x1b0] sm:$0xf] }
  0x3e   : >> { %270 = vst [vmem:[%s3787_s9 + $0x124] sm:$0xf] %v269_v41  ;;  %v273_v43 = vld [vmem:[%s3791_s10 + $0x1b4] sm:$0xf]  ;;  %v275_v44 = vld [vmem:[%s3791_s10 + $0x1b8] sm:$0xf] }
  0x3f   : >> { %272 = vst [vmem:[%s3787_s9 + $0x128] sm:$0xf] %v271_v42  ;;  %274 = vst [vmem:[%s3787_s9 + $0x12c] sm:$0xf] %v273_v43  ;;  %v277_v45 = vld [vmem:[%s3791_s10 + $0x1bc] sm:$0xf] }
  0x40   : >> { %276 = vst [vmem:[%s3787_s9 + $0x130] sm:$0xf] %v275_v44  ;;  %v279_v46 = vld [vmem:[%s3791_s10 + $0x1c0] sm:$0xf]  ;;  %v281_v47 = vld [vmem:[%s3791_s10 + $0x1c4] sm:$0xf] }
  0x41   : >> { %278 = vst [vmem:[%s3787_s9 + $0x134] sm:$0xf] %v277_v45  ;;  %280 = vst [vmem:[%s3787_s9 + $0x138] sm:$0xf] %v279_v46  ;;  %v283_v48 = vld [vmem:[%s3791_s10 + $0x24c] sm:$0xf] }
  0x42   : >> { %282 = vst [vmem:[%s3787_s9 + $0x13c] sm:$0xf] %v281_v47  ;;  %v285_v49 = vld [vmem:[%s3791_s10 + $0x250] sm:$0xf]  ;;  %v287_v50 = vld [vmem:[%s3791_s10 + $0x254] sm:$0xf] }
  0x43   : >> { %284 = vst [vmem:[%s3787_s9 + $0x180] sm:$0xf] %v283_v48  ;;  %286 = vst [vmem:[%s3787_s9 + $0x184] sm:$0xf] %v285_v49  ;;  %v289_v51 = vld [vmem:[%s3791_s10 + $0x258] sm:$0xf] }
  0x44   : >> { %288 = vst [vmem:[%s3787_s9 + $0x188] sm:$0xf] %v287_v50  ;;  %v291_v52 = vld [vmem:[%s3791_s10 + $0x25c] sm:$0xf]  ;;  %v293_v53 = vld [vmem:[%s3791_s10 + $0x260] sm:$0xf] }
  0x45   : >> { %290 = vst [vmem:[%s3787_s9 + $0x18c] sm:$0xf] %v289_v51  ;;  %292 = vst [vmem:[%s3787_s9 + $0x190] sm:$0xf] %v291_v52  ;;  %v295_v54 = vld [vmem:[%s3791_s10 + $0x264] sm:$0xf] }
  0x46   : >> { %294 = vst [vmem:[%s3787_s9 + $0x194] sm:$0xf] %v293_v53  ;;  %v297_v55 = vld [vmem:[%s3791_s10 + $0x268] sm:$0xf]  ;;  %v299_v56 = vld [vmem:[%s3791_s10 + $0x26c] sm:$0xf] }
  0x47   : >> { %296 = vst [vmem:[%s3787_s9 + $0x198] sm:$0xf] %v295_v54  ;;  %298 = vst [vmem:[%s3787_s9 + $0x19c] sm:$0xf] %v297_v55  ;;  %v301_v57 = vld [vmem:[%s3791_s10 + $0x270] sm:$0xf] }
  0x48   : >> { %300 = vst [vmem:[%s3787_s9 + $0x1a0] sm:$0xf] %v299_v56  ;;  %v303_v58 = vld [vmem:[%s3791_s10 + $0x274] sm:$0xf]  ;;  %v305_v59 = vld [vmem:[%s3791_s10 + $0x278] sm:$0xf] }
  0x49   : >> { %302 = vst [vmem:[%s3787_s9 + $0x1a4] sm:$0xf] %v301_v57  ;;  %304 = vst [vmem:[%s3787_s9 + $0x1a8] sm:$0xf] %v303_v58  ;;  %v307_v60 = vld [vmem:[%s3791_s10 + $0x27c] sm:$0xf] }
  0x4a   : >> { %306 = vst [vmem:[%s3787_s9 + $0x1ac] sm:$0xf] %v305_v59  ;;  %v309_v61 = vld [vmem:[%s3791_s10 + $0x280] sm:$0xf]  ;;  %v311_v62 = vld [vmem:[%s3791_s10 + $0x284] sm:$0xf] }
  0x4b   : >> { %308 = vst [vmem:[%s3787_s9 + $0x1b0] sm:$0xf] %v307_v60  ;;  %310 = vst [vmem:[%s3787_s9 + $0x1b4] sm:$0xf] %v309_v61  ;;  %v313_v63 = vld [vmem:[%s3791_s10 + $0x288] sm:$0xf] }
  0x4c   : >> { %312 = vst [vmem:[%s3787_s9 + $0x1b8] sm:$0xf] %v311_v62  ;;  %314 = vst [vmem:[%s3787_s9 + $0x1bc] sm:$0xf] %v313_v63  ;;  %s5257_s13 = smov (%p316_p10, %s315_s13), 0  ;;  %s181_s12 = sadd.s32 1, %s3799_s12  }
  0x4d   : >> { %s2894_s14 = sshll.u32 %s5257_s13, 6  ;;  %p180_p11 = scmp.ge.s32.totalorder %s181_s12, %s3925_s8 }
  0x4e   : >> { %s320_s10 = scalar_lea.vmem %s3919_s5, %s2894_s14   ;;  %s321_s9 = scalar_lea.vmem %s3922_s7, %s2894_s14 [#allocation2]  }
  0x4f   : >> { %s5143_s11 = smov %s5257_s13  ;;  %183 = sbr.rel (!%p180_p11) target bundleno = 34 (0x22), region = 206 }
  0x54 PF: > { %s4093_s20 = sand.u32 15, %s5255_s27   ;;  %s3186_s21 = sshll.u32 %s3925_s8, 6 }
  0x55   : > { %s4097_s24 = scalar_lea.vmem %s3919_s5, %s3186_s21   ;;  %s4100_s25 = scalar_lea.vmem %s3922_s7, %s3186_s21 [#allocation2]  }
  0x56   : > { %p2899_p12 = scmp.le.s32.totalorder %s4093_s20, 0 }
  0x57   : > { %s5144_s26 = smov (!%p2899_p12), %s4100_s25  ;;  %s5145_s28 = smov (!%p2899_p12), %s4097_s24 }
  0x58   : > { %2826 = sbr.rel (%p2899_p12) target bundleno = 105 (0x69), region = 211  ;;  %s3809_s29 = smov (!%p2899_p12), 0  }
  0x59   : > { %s3813_s30 = smov (!%p2899_p12), 0  }
  0x5d LB: >> { %v338_v0 = vld [vmem:[%s3807_s28] sm:$0xf]  ;;  %v340_v1 = vld [vmem:[%s3807_s28 + $0xc4] sm:$0xf]  ;;  %v342_v2 = vld [vmem:[%s3807_s28 + $0x188] sm:$0xf]  ;;  %s3815_s30 = sphi %s3813_s30, %s332_s30   ;;  %s3811_s29 = sphi %s3809_s29, %s3810_s29   ;;  %s3807_s28 = sphi %s5145_s28, %s351_s28   ;;  %s3803_s26 = sphi %s5144_s26, %s352_s26  }
  0x5e   : >> { %339 = vst [vmem:[%s3803_s26] sm:$0xf] %v338_v0  ;;  %341 = vst [vmem:[%s3803_s26 + $0x80] sm:$0xf] %v340_v1  ;;  %v344_v3 = vld [vmem:[%s3807_s28 + $0x24c] sm:$0xf]  ;;  %s346_s27 = sadd.s32 1, %s3811_s29 }
  0x5f   : >> { %343 = vst [vmem:[%s3803_s26 + $0x100] sm:$0xf] %v342_v2  ;;  %345 = vst [vmem:[%s3803_s26 + $0x180] sm:$0xf] %v344_v3  ;;  %p347_p13 = scmp.ge.s32.totalorder %s346_s27, %s4093_s20  ;;  %s332_s30 = sadd.s32 1, %s3815_s30  }
  0x60   : >> { %p331_p0 = scmp.ge.s32.totalorder %s332_s30, %s4093_s20 }
  0x61   : >> { %s5259_s27 = smov (%p347_p13, %s346_s27), 0 }
  0x62   : >> { %s2900_s5 = sshll.u32 %s5259_s27, 2  ;;  %s3810_s29 = smov %s5259_s27  }
  0x63   : >> { %s351_s28 = scalar_lea.vmem %s4097_s24, %s2900_s5   ;;  %s352_s26 = scalar_lea.vmem %s4100_s25, %s2900_s5 [#allocation2]  }
  0x64   : > { %334 = sbr.rel (!%p331_p0) target bundleno = 93 (0x5d), region = 217 }
  0x69 PF: > { %p2902_p1 = scmp.ge.s32.totalorder %s3783_s17, 1  ;;  %p575_p2 = scmp.lt.s32.totalorder %s3783_s17, 3 }
  0x6b   : > { %p576_p3 = pnand %p2902_p1, %p575_p2 }
  0x6d   : > { %579 = sbr.rel (%p576_p3) target bundleno = 562 (0x232), region = 94 }
  0x72   : > { %v3628_v4 = vld [vmem:[%s5098_s1 + $0x20] sm:$0x3f]   ;;  %vm817_vm0 = vcmask 1044480   ;;  %vm818_vm1 = vcmask 1045504   ;;  %v3849_v5 = vmov 65535   ;;  %v3629_v8 = vld [vmem:[%s5098_s1 + $0x18] sm:$0xff]  }
  0x73   : > { %v819_v6 = vsel %vm817_vm0, 4294967295, %v3849_v5  ;;  %s582_s10 = sand.u32 1, %s3775_s15   ;;  %v3630_v10 = vld [vmem:[%s5098_s1 + $0x10] sm:$0xff]   ;;  %vm768_vm2 = vcmask 613376   ;;  %v3631_v13 = vld [vmem:[%s5098_s1 + $0x8] sm:$0xff]   ;;  %v3632_v14 = vld [vmem:[%s5098_s1] sm:$0xff]  }
  0x74   : > { %v820_v7 = vsel %vm818_vm1, %v819_v6, 0  ;;  %s2903_s17 = sshll.u32 %s582_s10, 9  ;;  %vm2445_vm3 = vcmask 60416   ;;  %s4559_s30 = sshll.u32 %s582_s10, 7 }
  0x75   : > { %v822_v9 = vand.u32 %v3628_v4, %v820_v7  ;;  %s4133_s13 = scalar_lea.vmem [#allocation2], %s2903_s17  ;;  %s4586_s15 = scalar_lea.vmem [#allocation3], %s4559_s30  }
  0x76   : > { %v3633_v11 = vld [vmem:[%s4133_s13] sm:$0xff]   ;;  %v3635_v15 = vld [vmem:[%s4133_s13 + $0x8] sm:$0xff]   ;;  %v3637_v17 = vld [vmem:[%s4133_s13 + $0x10] sm:$0xff]   ;;  %s3169_s27 = sshll.u32 (%p3906_p5), %s3891_s18, 5  ;;  %s3220_s5 = sshll.u32 (%p3906_p5), %s3891_s18, 7 }
  0x77   : > { %3307 = vmatprep.subr.bf16.mxu0 %v822_v9  ;;  %3349 = vmatprep.subr.bf16.mxu1 %v822_v9  ;;  %v3634_v12 = vld [vmem:[%s4133_s13 + $0x80] sm:$0xff]   ;;  %v3636_v16 = vld [vmem:[%s4133_s13 + $0x88] sm:$0xff]   ;;  %v3638_v18 = vld [vmem:[%s4133_s13 + $0x90] sm:$0xff]   ;;  %s2486_s6 = ssub.s32 (%p3906_p5), 49, %s3169_s27  ;;  %s4969_s9 = scalar_lea.vmem (%p3906_p5), %s5101_s4, %s3220_s5  }
  0x78   : > { %3308 = vmatpush3.bf16.msra.mxu0 %v822_v9  ;;  %3350 = vmatpush3.bf16.msra.mxu1 %v822_v9  ;;  %v3639_v19 = vld [vmem:[%s4133_s13 + $0x18] sm:$0xff]   ;;  %v3641_v21 = vld [vmem:[%s4133_s13 + $0x20] sm:$0xff]   ;;  %v3643_v23 = vld [vmem:[%s4133_s13 + $0x28] sm:$0xff]   ;;  %p2487_p4 = scmp.lt.s32.totalorder (%p3906_p5), %s2486_s6, 32 }
  0x79   : > { %3309 = vmatprep.subr.bf16.mxu0 %v3629_v8  ;;  %3351 = vmatprep.subr.bf16.mxu1 %v3629_v8  ;;  %v3640_v20 = vld [vmem:[%s4133_s13 + $0x98] sm:$0xff]   ;;  %v3642_v22 = vld [vmem:[%s4133_s13 + $0xa0] sm:$0xff]   ;;  %v3644_v24 = vld [vmem:[%s4133_s13 + $0xa8] sm:$0xff]  }
  0x7a   : > { %3317 = vmatprep.mubr.msk.bf16.mxu0 %vm768_vm2, %v3633_v11  ;;  %3359 = vmatprep.mubr.msk.bf16.mxu1 %vm768_vm2, %v3634_v12  ;;  %v3645_v25 = vld [vmem:[%s4133_s13 + $0x30] sm:$0xff]   ;;  %v3647_v27 = vld [vmem:[%s4133_s13 + $0x38] sm:$0xff]   ;;  %v3649_v29 = vld [vmem:[%s4133_s13 + $0x40] sm:$0xff]  }
  0x7b   : > { %v3646_v26 = vld [vmem:[%s4133_s13 + $0xb0] sm:$0xff]   ;;  %v3648_v28 = vld [vmem:[%s4133_s13 + $0xb8] sm:$0xff]   ;;  %v3650_v30 = vld [vmem:[%s4133_s13 + $0xc0] sm:$0xff]  }
  0x7c   : > { %3310 = vmatpush3.bf16.msra.mxu0 %v3629_v8  ;;  %3352 = vmatpush3.bf16.msra.mxu1 %v3629_v8  ;;  %v3651_v31 = vld [vmem:[%s4133_s13 + $0x48] sm:$0xff]   ;;  %v3653_v33 = vld [vmem:[%s4133_s13 + $0x50] sm:$0xff]   ;;  %v3655_v35 = vld [vmem:[%s4133_s13 + $0x58] sm:$0xff]  }
  0x7d   : > { %3311 = vmatprep.subr.bf16.mxu0 %v3630_v10  ;;  %3353 = vmatprep.subr.bf16.mxu1 %v3630_v10  ;;  %v3652_v32 = vld [vmem:[%s4133_s13 + $0xc8] sm:$0xff]   ;;  %v3654_v34 = vld [vmem:[%s4133_s13 + $0xd0] sm:$0xff]   ;;  %v3656_v36 = vld [vmem:[%s4133_s13 + $0xd8] sm:$0xff]  }
  0x7e   : > { %v3657_v37 = vld [vmem:[%s4133_s13 + $0x60] sm:$0xff]   ;;  %v3659_v39 = vld [vmem:[%s4133_s13 + $0x68] sm:$0xff]   ;;  %v3661_v41 = vld [vmem:[%s4133_s13 + $0x70] sm:$0xff]  }
  0x7f   : > { %v3658_v38 = vld [vmem:[%s4133_s13 + $0xe0] sm:$0xff]   ;;  %v3660_v40 = vld [vmem:[%s4133_s13 + $0xe8] sm:$0xff]   ;;  %v3662_v42 = vld [vmem:[%s4133_s13 + $0xf0] sm:$0xff]  }
  0x80   : > { %3312 = vmatpush3.bf16.msra.mxu0 %v3630_v10  ;;  %3354 = vmatpush3.bf16.msra.mxu1 %v3630_v10  ;;  %v3663_v43 = vld [vmem:[%s4133_s13 + $0x78] sm:$0xff]   ;;  %v3665_v45 = vld [vmem:[%s4133_s13 + $0x100] sm:$0xff]   ;;  %v3667_v47 = vld [vmem:[%s4133_s13 + $0x108] sm:$0xff]  }
  0x81   : > { %3313 = vmatprep.subr.bf16.mxu0 %v3631_v13  ;;  %3355 = vmatprep.subr.bf16.mxu1 %v3631_v13  ;;  %v3664_v44 = vld [vmem:[%s4133_s13 + $0xf8] sm:$0xff]   ;;  %v3666_v46 = vld [vmem:[%s4133_s13 + $0x180] sm:$0xff]   ;;  %v3668_v48 = vld [vmem:[%s4133_s13 + $0x188] sm:$0xff]  }
  0x82   : > { %v3669_v49 = vld [vmem:[%s4133_s13 + $0x110] sm:$0xff]   ;;  %v3671_v51 = vld [vmem:[%s4133_s13 + $0x118] sm:$0xff]   ;;  %v3673_v53 = vld [vmem:[%s4133_s13 + $0x120] sm:$0xff]  }
  0x83   : > { %v3670_v50 = vld [vmem:[%s4133_s13 + $0x190] sm:$0xff]   ;;  %v3672_v52 = vld [vmem:[%s4133_s13 + $0x198] sm:$0xff]   ;;  %v3674_v54 = vld [vmem:[%s4133_s13 + $0x1a0] sm:$0xff]  }
  0x84   : > { %3314 = vmatpush3.bf16.msra.mxu0 %v3631_v13  ;;  %3356 = vmatpush3.bf16.msra.mxu1 %v3631_v13  ;;  %v3675_v55 = vld [vmem:[%s4133_s13 + $0x128] sm:$0xff]   ;;  %v3677_v57 = vld [vmem:[%s4133_s13 + $0x130] sm:$0xff]   ;;  %v3679_v59 = vld [vmem:[%s4133_s13 + $0x138] sm:$0xff]  }
  0x85   : > { %3315 = vmatprep.subr.bf16.mxu0 %v3632_v14  ;;  %3357 = vmatprep.subr.bf16.mxu1 %v3632_v14  ;;  %v3676_v56 = vld [vmem:[%s4133_s13 + $0x1a8] sm:$0xff]   ;;  %v3678_v58 = vld [vmem:[%s4133_s13 + $0x1b0] sm:$0xff]   ;;  %v3680_v60 = vld [vmem:[%s4133_s13 + $0x1b8] sm:$0xff]  }
  0x86   : > { %v3681_v61 = vld [vmem:[%s4133_s13 + $0x140] sm:$0xff]   ;;  %v3683_v63 = vld [vmem:[%s4133_s13 + $0x148] sm:$0xff]   ;;  %v3685_v1 = vld [vmem:[%s4133_s13 + $0x150] sm:$0xff]  }
  0x87   : > { %v3682_v62 = vld [vmem:[%s4133_s13 + $0x1c0] sm:$0xff]   ;;  %v3684_v0 = vld [vmem:[%s4133_s13 + $0x1c8] sm:$0xff]   ;;  %v3686_v2 = vld [vmem:[%s4133_s13 + $0x1d0] sm:$0xff]  }
  0x88   : > { %3316 = vmatpush3.bf16.msra.mxu0 %v3632_v14  ;;  %3358 = vmatpush3.bf16.msra.mxu1 %v3632_v14  ;;  %v3687_v3 = vld [vmem:[%s4133_s13 + $0x158] sm:$0xff]   ;;  %v3689_v5 = vld [vmem:[%s4133_s13 + $0x160] sm:$0xff]   ;;  %v3691_v7 = vld [vmem:[%s4133_s13 + $0x168] sm:$0xff]  }
  0x89   : > { %3391 = vmatprep.subr.bf16.mxu0 %v822_v9  ;;  %3433 = vmatprep.subr.bf16.mxu1 %v822_v9  ;;  %v3688_v4 = vld [vmem:[%s4133_s13 + $0x1d8] sm:$0xff]   ;;  %v3690_v6 = vld [vmem:[%s4133_s13 + $0x1e0] sm:$0xff]  }
  0x8a   : > { %v3695_v11 = vld [vmem:[%s4133_s13 + $0x178] sm:$0xff]  }
  0x8b   : > { %3318 = vmatmul.mubr.msk.bf16.vlgmr.msra.gmra.mxu0 %vm768_vm2, %v3635_v15  ;;  %3360 = vmatmul.mubr.msk.bf16.vlgmr.msra.gmra.mxu1 %vm768_vm2, %v3636_v16  ;;  %v3696_v12 = vld [vmem:[%s4133_s13 + $0x1f8] sm:$0xff]  }
  0x8c   : > { %3392 = vmatpush3.bf16.msra.mxu0 %v822_v9  ;;  %3434 = vmatpush3.bf16.msra.mxu1 %v822_v9  ;;  %v3693_v9 = vld [vmem:[%s4133_s13 + $0x170] sm:$0xff]  }
  0x8d   : > { %3321 = vmatprep.mubr.msk.bf16.mxu0 %vm768_vm2, %v3637_v17  ;;  %3363 = vmatprep.mubr.msk.bf16.mxu1 %vm768_vm2, %v3638_v18 }
  0x8e   : > { %3393 = vmatprep.subr.bf16.mxu0 %v3629_v8  ;;  %3435 = vmatprep.subr.bf16.mxu1 %v3629_v8 }
  0x90   : > { %3394 = vmatpush3.bf16.msra.mxu0 %v3629_v8  ;;  %3436 = vmatpush3.bf16.msra.mxu1 %v3629_v8  ;;  %v3692_v8 = vld [vmem:[%s4133_s13 + $0x1e8] sm:$0xff]  }
  0x91   : > { %3395 = vmatprep.subr.bf16.mxu0 %v3630_v10  ;;  %3437 = vmatprep.subr.bf16.mxu1 %v3630_v10 }
  0x93   : > { %3322 = vmatmul.mubr.msk.bf16.gmra.mxu0 %vm768_vm2, %v3639_v19  ;;  %3364 = vmatmul.mubr.msk.bf16.gmra.mxu1 %vm768_vm2, %v3640_v20 }
  0x94   : > { %3325 = vmatprep.mubr.msk.bf16.mxu0 %vm768_vm2, %v3641_v21  ;;  %3367 = vmatprep.mubr.msk.bf16.mxu1 %vm768_vm2, %v3642_v22 }
  0x95   : > { %3396 = vmatpush3.bf16.msra.mxu0 %v3630_v10  ;;  %3438 = vmatpush3.bf16.msra.mxu1 %v3630_v10  ;;  %v3694_v10 = vld [vmem:[%s4133_s13 + $0x1f0] sm:$0xff]  }
  0x96   : > { %3397 = vmatprep.subr.bf16.mxu0 %v3631_v13  ;;  %3439 = vmatprep.subr.bf16.mxu1 %v3631_v13 }
  0x99   : > { %3398 = vmatpush3.bf16.msra.mxu0 %v3631_v13  ;;  %3440 = vmatpush3.bf16.msra.mxu1 %v3631_v13 }
  0x9a   : > { %3399 = vmatprep.subr.bf16.mxu0 %v3632_v14  ;;  %3441 = vmatprep.subr.bf16.mxu1 %v3632_v14 }
  0x9b   : > { %3326 = vmatmul.mubr.msk.bf16.gmra.mxu0 %vm768_vm2, %v3643_v23  ;;  %3368 = vmatmul.mubr.msk.bf16.gmra.mxu1 %vm768_vm2, %v3644_v24 }
  0x9c   : > { %3329 = vmatprep.mubr.msk.bf16.mxu0 %vm768_vm2, %v3645_v25  ;;  %3371 = vmatprep.mubr.msk.bf16.mxu1 %vm768_vm2, %v3646_v26 }
  0x9d   : > { %3400 = vmatpush3.bf16.msra.mxu0 %v3632_v14  ;;  %3442 = vmatpush3.bf16.msra.mxu1 %v3632_v14 }
  0xa3   : > { %3330 = vmatmul.mubr.msk.bf16.gmra.mxu0 %vm768_vm2, %v3647_v27  ;;  %3372 = vmatmul.mubr.msk.bf16.gmra.mxu1 %vm768_vm2, %v3648_v28 }
  0xa4   : > { %3333 = vmatprep.mubr.msk.bf16.mxu0 %vm768_vm2, %v3649_v29  ;;  %3375 = vmatprep.mubr.msk.bf16.mxu1 %vm768_vm2, %v3650_v30 }
  0xab   : > { %3334 = vmatmul.mubr.msk.bf16.gmra.mxu0 %vm768_vm2, %v3651_v31  ;;  %3376 = vmatmul.mubr.msk.bf16.gmra.mxu1 %vm768_vm2, %v3652_v32 }
  0xac   : > { %3337 = vmatprep.mubr.msk.bf16.mxu0 %vm768_vm2, %v3653_v33  ;;  %3379 = vmatprep.mubr.msk.bf16.mxu1 %vm768_vm2, %v3654_v34 }
  0xb3   : > { %3338 = vmatmul.mubr.msk.bf16.gmra.mxu0 %vm768_vm2, %v3655_v35  ;;  %3380 = vmatmul.mubr.msk.bf16.gmra.mxu1 %vm768_vm2, %v3656_v36 }
  0xb4   : > { %3341 = vmatprep.mubr.msk.bf16.mxu0 %vm768_vm2, %v3657_v37  ;;  %3383 = vmatprep.mubr.msk.bf16.mxu1 %vm768_vm2, %v3658_v38 }
  0xbb   : > { %3342 = vmatmul.mubr.msk.bf16.gmra.mxu0 %vm768_vm2, %v3659_v39  ;;  %3384 = vmatmul.mubr.msk.bf16.gmra.mxu1 %vm768_vm2, %v3660_v40 }
  0xbc   : > { %3345 = vmatprep.mubr.msk.bf16.mxu0 %vm768_vm2, %v3661_v41  ;;  %3387 = vmatprep.mubr.msk.bf16.mxu1 %vm768_vm2, %v3662_v42 }
  0xc3   : > { %3346 = vmatmul.mubr.msk.bf16.gmra.mxu0 %vm768_vm2, %v3663_v43  ;;  %3388 = vmatmul.mubr.msk.bf16.gmra.mxu1 %vm768_vm2, %v3664_v44 }
  0xc4   : > { %3401 = vmatprep.mubr.msk.bf16.mxu0 %vm768_vm2, %v3665_v45  ;;  %3443 = vmatprep.mubr.msk.bf16.mxu1 %vm768_vm2, %v3666_v46 }
  0xcb   : > { %3402 = vmatmul.mubr.msk.bf16.vlgmr.msra.gmra.mxu0 %vm768_vm2, %v3667_v47  ;;  %3444 = vmatmul.mubr.msk.bf16.vlgmr.msra.gmra.mxu1 %vm768_vm2, %v3668_v48 }
  0xcc   : > { %3405 = vmatprep.mubr.msk.bf16.mxu0 %vm768_vm2, %v3669_v49  ;;  %3447 = vmatprep.mubr.msk.bf16.mxu1 %vm768_vm2, %v3670_v50 }
  0xd3   : > { %3406 = vmatmul.mubr.msk.bf16.gmra.mxu0 %vm768_vm2, %v3671_v51  ;;  %3448 = vmatmul.mubr.msk.bf16.gmra.mxu1 %vm768_vm2, %v3672_v52 }
  0xd4   : > { %3409 = vmatprep.mubr.msk.bf16.mxu0 %vm768_vm2, %v3673_v53  ;;  %3451 = vmatprep.mubr.msk.bf16.mxu1 %vm768_vm2, %v3674_v54 }
  0xdb   : > { %3410 = vmatmul.mubr.msk.bf16.gmra.mxu0 %vm768_vm2, %v3675_v55  ;;  %3452 = vmatmul.mubr.msk.bf16.gmra.mxu1 %vm768_vm2, %v3676_v56 }
  0xdc   : > { %3413 = vmatprep.mubr.msk.bf16.mxu0 %vm768_vm2, %v3677_v57  ;;  %3455 = vmatprep.mubr.msk.bf16.mxu1 %vm768_vm2, %v3678_v58 }
  0xe3   : > { %3414 = vmatmul.mubr.msk.bf16.gmra.mxu0 %vm768_vm2, %v3679_v59  ;;  %3456 = vmatmul.mubr.msk.bf16.gmra.mxu1 %vm768_vm2, %v3680_v60 }
  0xe4   : > { %3417 = vmatprep.mubr.msk.bf16.mxu0 %vm768_vm2, %v3681_v61  ;;  %3459 = vmatprep.mubr.msk.bf16.mxu1 %vm768_vm2, %v3682_v62 }
  0xeb   : > { %3418 = vmatmul.mubr.msk.bf16.gmra.mxu0 %vm768_vm2, %v3683_v63  ;;  %3460 = vmatmul.mubr.msk.bf16.gmra.mxu1 %vm768_vm2, %v3684_v0 }
  0xec   : > { %3421 = vmatprep.mubr.msk.bf16.mxu0 %vm768_vm2, %v3685_v1  ;;  %3463 = vmatprep.mubr.msk.bf16.mxu1 %vm768_vm2, %v3686_v2 }
  0xf3   : > { %3422 = vmatmul.mubr.msk.bf16.gmra.mxu0 %vm768_vm2, %v3687_v3  ;;  %3464 = vmatmul.mubr.msk.bf16.gmra.mxu1 %vm768_vm2, %v3688_v4 }
  0xf4   : > { %3425 = vmatprep.mubr.msk.bf16.mxu0 %vm768_vm2, %v3689_v5  ;;  %3467 = vmatprep.mubr.msk.bf16.mxu1 %vm768_vm2, %v3690_v6 }
  0xfb   : > { %3426 = vmatmul.mubr.msk.bf16.gmra.mxu0 %vm768_vm2, %v3691_v7  ;;  %3468 = vmatmul.mubr.msk.bf16.gmra.mxu1 %vm768_vm2, %v3692_v8  ;;  %v4528_v7 = vld [vmem:[%s5099_s2] ss:$0 sm:$0xff] }
  0xfc   : > { %3429 = vmatprep.mubr.msk.bf16.mxu0 %vm768_vm2, %v3693_v9  ;;  %3471 = vmatprep.mubr.msk.bf16.mxu1 %vm768_vm2, %v3694_v10 }
 0x103   : > { %3430 = vmatmul.mubr.msk.bf16.gmra.mxu0 %vm768_vm2, %v3695_v11  ;;  %3472 = vmatmul.mubr.msk.bf16.gmra.mxu1 %vm768_vm2, %v3696_v12 }
 0x14b   : > { %v4269_v13 = vpop.f32.mrf.mxu0  ;;  %v4271_v14 = vpop.f32.mrf.mxu1 }
 0x14c   : > { %v5166_v11 = vmin.f32 %v4269_v13, %v4271_v14 }
 0x14d   : > { %v4277_v17 = vpop.f32.mrf.mxu0  ;;  %v4279_v18 = vpop.f32.mrf.mxu1 }
 0x14f   : > { %v4285_v21 = vpop.f32.mrf.mxu0  ;;  %v4287_v22 = vpop.f32.mrf.mxu1 }
 0x151   : > { %v4293_v25 = vpop.f32.mrf.mxu0  ;;  %v4295_v26 = vpop.f32.mrf.mxu1 }
 0x153   : > { %v4301_v29 = vpop.f32.mrf.mxu0  ;;  %v4303_v30 = vpop.f32.mrf.mxu1 }
 0x155   : > { %v4309_v33 = vpop.f32.mrf.mxu0  ;;  %v4311_v34 = vpop.f32.mrf.mxu1 }
 0x157   : > { %v4317_v37 = vpop.f32.mrf.mxu0  ;;  %v4319_v38 = vpop.f32.mrf.mxu1 }
 0x159   : > { %v4325_v41 = vpop.f32.mrf.mxu0  ;;  %v4327_v42 = vpop.f32.mrf.mxu1 }
 0x15b   : > { %v4333_v45 = vpop.f32.mrf.mxu0  ;;  %v4335_v46 = vpop.f32.mrf.mxu1 }
 0x15d   : > { %v4341_v49 = vpop.f32.mrf.mxu0  ;;  %v4343_v50 = vpop.f32.mrf.mxu1 }
 0x15f   : > { %v4349_v53 = vpop.f32.mrf.mxu0  ;;  %v4351_v54 = vpop.f32.mrf.mxu1 }
 0x161   : > { %v4357_v57 = vpop.f32.mrf.mxu0  ;;  %v4359_v58 = vpop.f32.mrf.mxu1 }
 0x163   : > { %v4365_v61 = vpop.f32.mrf.mxu0  ;;  %v4367_v62 = vpop.f32.mrf.mxu1 }
 0x165   : > { %v4373_v1 = vpop.f32.mrf.mxu0  ;;  %v4375_v2 = vpop.f32.mrf.mxu1 }
 0x167   : > { %v4381_v5 = vpop.f32.mrf.mxu0  ;;  %v4383_v6 = vpop.f32.mrf.mxu1 }
 0x169   : > { %v4389_v9 = vpop.f32.mrf.mxu0  ;;  %v4391_v10 = vpop.f32.mrf.mxu1 }
 0x16b   : > { %v4397_v4 = vpop.f32.mrf.mxu0  ;;  %v4399_v3 = vpop.f32.mrf.mxu1 }
 0x16d   : > { %v4405_v0 = vpop.f32.mrf.mxu0  ;;  %v4407_v63 = vpop.f32.mrf.mxu1 }
 0x16f   : > { %v4413_v60 = vpop.f32.mrf.mxu0  ;;  %v4415_v59 = vpop.f32.mrf.mxu1 }
 0x171   : > { %v4421_v56 = vpop.f32.mrf.mxu0  ;;  %v4423_v55 = vpop.f32.mrf.mxu1 }
 0x173   : > { %v4429_v52 = vpop.f32.mrf.mxu0  ;;  %v4431_v51 = vpop.f32.mrf.mxu1 }
 0x175   : > { %v4437_v48 = vpop.f32.mrf.mxu0  ;;  %v4439_v47 = vpop.f32.mrf.mxu1 }
 0x177   : > { %v4445_v44 = vpop.f32.mrf.mxu0  ;;  %v4447_v43 = vpop.f32.mrf.mxu1 }
 0x178   : > { %5146 = vst [vmem:[#allocation4_spill] sm:$0xff] %v4447_v43 }
 0x179   : > { %v4453_v40 = vpop.f32.mrf.mxu0  ;;  %v4455_v39 = vpop.f32.mrf.mxu1 }
 0x17a   : > { %5147 = vst [vmem:[#allocation5_spill] sm:$0xff] %v4453_v40  ;;  %5148 = vst [vmem:[#allocation6_spill] sm:$0xff] %v4455_v39  ;;  %v5168_v40 = vmin.f32 %v4277_v17, %v4279_v18 }
 0x17b   : > { %v4461_v36 = vpop.f32.mrf.mxu0  ;;  %v4463_v35 = vpop.f32.mrf.mxu1 }
 0x17c   : > { %5149 = vst [vmem:[#allocation7_spill] sm:$0xff] %v4461_v36  ;;  %5150 = vst [vmem:[#allocation8_spill] sm:$0xff] %v4463_v35  ;;  %v5167_v36 = vmax.f32 %v4277_v17, %v4279_v18  ;;  %v5169_v17 = vmax.f32 %v4285_v21, %v4287_v22 }
 0x17d   : > { %v4469_v32 = vpop.f32.mrf.mxu0  ;;  %v4471_v31 = vpop.f32.mrf.mxu1 }
 0x17e   : > { %5151 = vst [vmem:[#allocation9_spill] sm:$0xff] %v4469_v32  ;;  %5152 = vst [vmem:[#allocation10_spill] sm:$0xff] %v4471_v31 }
 0x17f   : > { %v4477_v28 = vpop.f32.mrf.mxu0  ;;  %v4479_v27 = vpop.f32.mrf.mxu1 }
 0x180   : > { %5153 = vst [vmem:[#allocation11_spill] sm:$0xff] %v4477_v28  ;;  %5154 = vst [vmem:[#allocation12_spill] sm:$0xff] %v4479_v27 }
 0x181   : > { %v4485_v24 = vpop.f32.mrf.mxu0  ;;  %v4487_v23 = vpop.f32.mrf.mxu1 }
 0x182   : > { %5155 = vst [vmem:[#allocation13_spill] sm:$0xff] %v4485_v24  ;;  %5156 = vst [vmem:[#allocation14_spill] sm:$0xff] %v4487_v23 }
 0x183   : > { %v4493_v20 = vpop.f32.mrf.mxu0  ;;  %v4495_v19 = vpop.f32.mrf.mxu1 }
 0x184   : > { %5157 = vst [vmem:[#allocation15_spill] sm:$0xff] %v4493_v20  ;;  %5158 = vst [vmem:[#allocation16_spill] sm:$0xff] %v4495_v19 }
 0x185   : > { %v4501_v16 = vpop.f32.mrf.mxu0  ;;  %v4503_v15 = vpop.f32.mrf.mxu1 }
 0x186   : > { %5159 = vst [vmem:[#allocation17_spill] sm:$0xff] %v4501_v16  ;;  %5160 = vst [vmem:[#allocation18_spill] sm:$0xff] %v4503_v15 }
 0x187   : > { %v4509_v23 = vpop.f32.mrf.mxu0  ;;  %v4511_v24 = vpop.f32.mrf.mxu1 }
 0x188   : > { %5161 = vst [vmem:[#allocation19_spill] sm:$0xff] %v4509_v23  ;;  %5162 = vst [vmem:[#allocation20_spill] sm:$0xff] %v4511_v24  ;;  %v5165_v23 = vmax.f32 %v4269_v13, %v4271_v14  ;;  %v4547_v13 = vld [vmem:[%s5100_s3] ss:$0 sm:$0xff] }
 0x189   : > { %v4517_v19 = vpop.f32.mrf.mxu0  ;;  %v4519_v20 = vpop.f32.mrf.mxu1 }
 0x18a   : > { %5163 = vst [vmem:[#allocation21_spill] sm:$0xff] %v4517_v19  ;;  %5164 = vst [vmem:[#allocation22_spill] sm:$0xff] %v4519_v20 }
 0x18b   : > { %v3403_v15 = vpop.f32.mrf.mxu0  ;;  %v3445_v16 = vpop.f32.mrf.mxu1 }
 0x18c   : > { %v1985_v27 = vmax.f32 %v3403_v15, %v3445_v16  ;;  %v2081_v28 = vmin.f32 %v3403_v15, %v3445_v16 }
 0x18d   : > { %v1502_v8 = vpop.f32.mrf.mxu0  ;;  %v1824_v24 = vpop.f32.mrf.mxu1 }
 0x18e   : > { %v2017_v31 = vmax.f32 %v5165_v23, %v1985_v27  ;;  %v2113_v32 = vmin.f32 %v5166_v11, %v2081_v28  ;;  %v1983_v12 = vmax.f32 %v1502_v8, %v1824_v24  ;;  %v2079_v20 = vmin.f32 %v1502_v8, %v1824_v24 }
 0x18f   : > { %v3404_v19 = vpop.f32.mrf.mxu0  ;;  %v3446_v35 = vpop.f32.mrf.mxu1 }
 0x190   : > { %v2153_v15 = vmul.f32 %v4528_v7, %v2017_v31  ;;  %v2185_v16 = vmul.f32 %v4528_v7, %v2113_v32  ;;  %v2015_v39 = vmax.f32 %v5167_v36, %v1983_v12  ;;  %v2111_v23 = vmin.f32 %v5168_v40, %v2079_v20 }
 0x191   : > { %v1986_v14 = vmax.f32 %v3404_v19, %v3446_v35  ;;  %v2082_v24 = vmin.f32 %v3404_v19, %v3446_v35  ;;  %v1505_v27 = vpop.f32.mrf.mxu0  ;;  %v1827_v28 = vpop.f32.mrf.mxu1  ;;  %v5170_v20 = vmin.f32 %v4285_v21, %v4287_v22  ;;  %v5172_v21 = vmin.f32 %v4293_v25, %v4295_v26 }
 0x192   : > { %v2217_v31 = vmax.f32 %v2153_v15, %v2185_v16  ;;  %v2151_v32 = vmul.f32 %v4528_v7, %v2015_v39  ;;  %v2183_v8 = vmul.f32 %v4528_v7, %v2111_v23  ;;  %v1984_v36 = vmax.f32 %v1505_v27, %v1827_v28 }
 0x193   : > { %v2018_v18 = vmax.f32 %v5169_v17, %v1986_v14  ;;  %v2114_v40 = vmin.f32 %v5170_v20, %v2082_v24  ;;  %v2080_v11 = vmin.f32 %v1505_v27, %v1827_v28  ;;  %v3407_v12 = vpop.f32.mrf.mxu0  ;;  %v3449_v19 = vpop.f32.mrf.mxu1  ;;  %v5171_v15 = vmax.f32 %v4293_v25, %v4295_v26 }
 0x194   : > { %v2255_v35 = vadd.f32 %v4547_v13, %v2217_v31  ;;  %v2215_v39 = vmax.f32 %v2151_v32, %v2183_v8  ;;  %v1989_v23 = vmax.f32 %v3407_v12, %v3449_v19  ;;  %v2085_v24 = vmin.f32 %v3407_v12, %v3449_v19 }
 0x195   : > { %v2016_v16 = vmax.f32 %v5171_v15, %v1984_v36  ;;  %v2154_v14 = vmul.f32 %v4528_v7, %v2018_v18  ;;  %v2186_v17 = vmul.f32 %v4528_v7, %v2114_v40  ;;  %v2112_v22 = vmin.f32 %v5172_v21, %v2080_v11  ;;  %v1518_v27 = vpop.f32.mrf.mxu0  ;;  %v1840_v28 = vpop.f32.mrf.mxu1 }
 0x196   : > { %v2287_v20 = vmax.f32 %v2255_v35, 0.0  ;;  %v2253_v31 = vadd.f32 %v4547_v13, %v2215_v39  ;;  %v5173_v8 = vmax.f32 %v4301_v29, %v4303_v30  ;;  %v5174_v25 = vmin.f32 %v4301_v29, %v4303_v30 }
 0x197   : > { %v2152_v32 = vmul.f32 %v4528_v7, %v2016_v16  ;;  %v2218_v15 = vmax.f32 %v2154_v14, %v2186_v17  ;;  %v2184_v18 = vmul.f32 %v4528_v7, %v2112_v22  ;;  %v1987_v40 = vmax.f32 %v1518_v27, %v1840_v28  ;;  %v3408_v11 = vpop.f32.mrf.mxu0  ;;  %v3450_v12 = vpop.f32.mrf.mxu1 }
 0x198   : > { %v2021_v36 = vmax.f32 %v5173_v8, %v1989_v23  ;;  %v2117_v26 = vmin.f32 %v5174_v25, %v2085_v24  ;;  %v3190_v19 = vpack.c.bf16 %v2287_v20, %v2287_v20  ;;  %v2285_v35 = vmax.f32 %v2253_v31, 0.0 }
 0x199   : > { %v2083_v16 = vmin.f32 %v1518_v27, %v1840_v28  ;;  %v2256_v21 = vadd.f32 %v4547_v13, %v2218_v15  ;;  %v2216_v43 = vmax.f32 %v2152_v32, %v2184_v18  ;;  %v5175_v14 = vmax.f32 %v4309_v33, %v4311_v34  ;;  %v1521_v22 = vpop.f32.mrf.mxu0  ;;  %v1843_v29 = vpop.f32.mrf.mxu1 }
 0x19a   : > { %v2157_v39 = vmul.f32 %v4528_v7, %v2021_v36  ;;  %v2189_v23 = vmul.f32 %v4528_v7, %v2117_v26  ;;  %2448 = vst.msk [vmem:[%s4586_s15 + $0x8] sm:$0xf] %vm2445_vm3, %v3190_v19  ;;  %v3188_v30 = vpack.c.bf16 %v2285_v35, %v2285_v35  ;;  %v5176_v24 = vmin.f32 %v4309_v33, %v4311_v34 }
 0x19b   : > { %v2019_v17 = vmax.f32 %v5175_v14, %v1987_v40  ;;  %v1990_v28 = vmax.f32 %v3408_v11, %v3450_v12  ;;  %v2086_v20 = vmin.f32 %v3408_v11, %v3450_v12  ;;  %v2288_v31 = vmax.f32 %v2256_v21, 0.0  ;;  %v3411_v15 = vpop.f32.mrf.mxu0  ;;  %v3453_v18 = vpop.f32.mrf.mxu1 }
 0x19c   : > { %v2115_v27 = vmin.f32 %v5176_v24, %v2083_v16  ;;  %v2254_v32 = vadd.f32 %v4547_v13, %v2216_v43  ;;  %v2221_v8 = vmax.f32 %v2157_v39, %v2189_v23  ;;  %2446 = vst.msk [vmem:[%s4586_s15] sm:$0xf] %vm2445_vm3, %v3188_v30  ;;  %v5177_v26 = vmax.f32 %v4317_v37, %v4319_v38 }
 0x19d   : > { %v2155_v36 = vmul.f32 %v4528_v7, %v2019_v17  ;;  %v5178_v34 = vmin.f32 %v4317_v37, %v4319_v38  ;;  %v1988_v11 = vmax.f32 %v1521_v22, %v1843_v29  ;;  %v3191_v43 = vpack.c.bf16 %v2288_v31, %v2288_v31  ;;  %v1534_v39 = vpop.f32.mrf.mxu0  ;;  %v1856_v16 = vpop.f32.mrf.mxu1 }
 0x19e   : > { %v2187_v25 = vmul.f32 %v4528_v7, %v2115_v27  ;;  %v2022_v33 = vmax.f32 %v5177_v26, %v1990_v28  ;;  %v2286_v12 = vmax.f32 %v2254_v32, 0.0  ;;  %v2259_v19 = vadd.f32 %v4547_v13, %v2221_v8 }
 0x19f   : > { %v2118_v40 = vmin.f32 %v5178_v34, %v2086_v20  ;;  %v2084_v35 = vmin.f32 %v1521_v22, %v1843_v29  ;;  %v5179_v17 = vmax.f32 %v4325_v41, %v4327_v42  ;;  %2449 = vst.msk [vmem:[%s4586_s15 + $0xc] sm:$0xf] %vm2445_vm3, %v3191_v43  ;;  %v5180_v24 = vmin.f32 %v4325_v41, %v4327_v42  ;;  %v3412_v27 = vpop.f32.mrf.mxu0  ;;  %v3454_v28 = vpop.f32.mrf.mxu1 }
 0x1a0   : > { %v2219_v21 = vmax.f32 %v2155_v36, %v2187_v25  ;;  %v2158_v23 = vmul.f32 %v4528_v7, %v2022_v33  ;;  %v3189_v37 = vpack.c.bf16 %v2286_v12, %v2286_v12  ;;  %v2291_v38 = vmax.f32 %v2259_v19, 0.0 }
 0x1a1   : > { %v2190_v14 = vmul.f32 %v4528_v7, %v2118_v40  ;;  %v2020_v30 = vmax.f32 %v5179_v17, %v1988_v11  ;;  %v2116_v22 = vmin.f32 %v5180_v24, %v2084_v35  ;;  %v1993_v29 = vmax.f32 %v3411_v15, %v3453_v18  ;;  %v1537_v33 = vpop.f32.mrf.mxu0  ;;  %v1859_v34 = vpop.f32.mrf.mxu1 }
 0x1a2   : > { %v2257_v20 = vadd.f32 %v4547_v13, %v2219_v21  ;;  %v2089_v8 = vmin.f32 %v3411_v15, %v3453_v18  ;;  %2447 = vst.msk [vmem:[%s4586_s15 + $0x4] sm:$0xf] %vm2445_vm3, %v3189_v37  ;;  %v3194_v36 = vpack.c.bf16 %v2291_v38, %v2291_v38  ;;  %v5181_v26 = vmax.f32 %v4333_v45, %v4335_v46 }
 0x1a3   : > { %v2222_v31 = vmax.f32 %v2158_v23, %v2190_v14  ;;  %v2156_v32 = vmul.f32 %v4528_v7, %v2020_v30  ;;  %v2188_v25 = vmul.f32 %v4528_v7, %v2116_v22  ;;  %v1991_v42 = vmax.f32 %v1534_v39, %v1856_v16  ;;  %v3415_v14 = vpop.f32.mrf.mxu0  ;;  %v3457_v17 = vpop.f32.mrf.mxu1 }
 0x1a4   : > { %v2025_v41 = vmax.f32 %v5181_v26, %v1993_v29  ;;  %v2289_v40 = vmax.f32 %v2257_v20, 0.0  ;;  %v5182_v43 = vmin.f32 %v4333_v45, %v4335_v46  ;;  %v2087_v15 = vmin.f32 %v1534_v39, %v1856_v16  ;;  %2452 = vst.msk [vmem:[%s4586_s15 + $0x18] sm:$0xf] %vm2445_vm3, %v3194_v36 }
 0x1a5   : > { %v2260_v11 = vadd.f32 %v4547_v13, %v2222_v31  ;;  %v2220_v18 = vmax.f32 %v2156_v32, %v2188_v25  ;;  %v5183_v35 = vmax.f32 %v4341_v49, %v4343_v50  ;;  %v1994_v23 = vmax.f32 %v3412_v27, %v3454_v28  ;;  %v1550_v20 = vpop.f32.mrf.mxu0  ;;  %v1872_v31 = vpop.f32.mrf.mxu1 }
 0x1a6   : > { %v2121_v12 = vmin.f32 %v5182_v43, %v2089_v8  ;;  %v2161_v19 = vmul.f32 %v4528_v7, %v2025_v41  ;;  %v3192_v30 = vpack.c.bf16 %v2289_v40, %v2289_v40  ;;  %v5184_v45 = vmin.f32 %v4341_v49, %v4343_v50 }
 0x1a7   : > { %v2023_v21 = vmax.f32 %v5183_v35, %v1991_v42  ;;  %v2292_v37 = vmax.f32 %v2260_v11, 0.0  ;;  %v2258_v39 = vadd.f32 %v4547_v13, %v2220_v18  ;;  %v5185_v24 = vmax.f32 %v4349_v53, %v4351_v54  ;;  %v3416_v40 = vpop.f32.mrf.mxu0  ;;  %v3458_v11 = vpop.f32.mrf.mxu1 }
 0x1a8   : > { %v2193_v38 = vmul.f32 %v4528_v7, %v2121_v12  ;;  %v2119_v46 = vmin.f32 %v5184_v45, %v2087_v15  ;;  %v2090_v29 = vmin.f32 %v3412_v27, %v3454_v28  ;;  %2450 = vst.msk [vmem:[%s4586_s15 + $0x10] sm:$0xf] %vm2445_vm3, %v3192_v30  ;;  %v1992_v49 = vmax.f32 %v1537_v33, %v1859_v34 }
 0x1a9   : > { %v2159_v16 = vmul.f32 %v4528_v7, %v2023_v21  ;;  %v2026_v22 = vmax.f32 %v5185_v24, %v1994_v23  ;;  %v3195_v32 = vpack.c.bf16 %v2292_v37, %v2292_v37  ;;  %v2290_v50 = vmax.f32 %v2258_v39, 0.0  ;;  %v1875_v35 = vpop.f32.mrf.mxu1 }
 0x1aa   : > { %v2225_v8 = vmax.f32 %v2161_v19, %v2193_v38  ;;  %v2191_v36 = vmul.f32 %v4528_v7, %v2119_v46  ;;  %v5186_v25 = vmin.f32 %v4349_v53, %v4351_v54  ;;  %v2088_v42 = vmin.f32 %v1537_v33, %v1859_v34  ;;  %v1553_v19 = vpop.f32.mrf.mxu0 }
 0x1ab   : > { %v2162_v41 = vmul.f32 %v4528_v7, %v2026_v22  ;;  %2453 = vst.msk [vmem:[%s4586_s15 + $0x1c] sm:$0xf] %vm2445_vm3, %v3195_v32  ;;  %v5187_v43 = vmax.f32 %v4357_v57, %v4359_v58  ;;  %v1997_v15 = vmax.f32 %v3415_v14, %v3457_v17  ;;  %v3193_v18 = vpack.c.bf16 %v2290_v50, %v2290_v50  ;;  %v3461_v39 = vpop.f32.mrf.mxu1 }
 0x1ac   : > { %v2122_v26 = vmin.f32 %v5186_v25, %v2090_v29  ;;  %v2263_v27 = vadd.f32 %v4547_v13, %v2225_v8  ;;  %v2223_v28 = vmax.f32 %v2159_v16, %v2191_v36  ;;  %v5188_v54 = vmin.f32 %v4357_v57, %v4359_v58 }
 0x1ad   : > { %v2024_v12 = vmax.f32 %v5187_v43, %v1992_v49  ;;  %v2093_v34 = vmin.f32 %v3415_v14, %v3457_v17  ;;  %v5189_v37 = vmax.f32 %v4365_v61, %v4367_v62  ;;  %2451 = vst.msk [vmem:[%s4586_s15 + $0x14] sm:$0xf] %vm2445_vm3, %v3193_v18  ;;  %v5190_v57 = vmin.f32 %v4365_v61, %v4367_v62  ;;  %v3419_v17 = vpop.f32.mrf.mxu0  ;;  %v1888_v62 = vpop.f32.mrf.mxu1 }
 0x1ae   : > { %v2194_v53 = vmul.f32 %v4528_v7, %v2122_v26  ;;  %v2120_v33 = vmin.f32 %v5188_v54, %v2088_v42  ;;  %v2295_v21 = vmax.f32 %v2263_v27, 0.0  ;;  %v2261_v23 = vadd.f32 %v4547_v13, %v2223_v28 }
 0x1af   : > { %v2160_v30 = vmul.f32 %v4528_v7, %v2024_v12  ;;  %v2029_v38 = vmax.f32 %v5189_v37, %v1997_v15  ;;  %v2125_v58 = vmin.f32 %v5190_v57, %v2093_v34  ;;  %v1995_v14 = vmax.f32 %v1550_v20, %v1872_v31  ;;  %v1566_v61 = vpop.f32.mrf.mxu0  ;;  %v3462_v15 = vpop.f32.mrf.mxu1 }
 0x1b0   : > { %v2226_v45 = vmax.f32 %v2162_v41, %v2194_v53  ;;  %v2192_v46 = vmul.f32 %v4528_v7, %v2120_v33  ;;  %v3198_v16 = vpack.c.bf16 %v2295_v21, %v2295_v21  ;;  %v2293_v24 = vmax.f32 %v2261_v23, 0.0 }
 0x1b1   : > { %v2165_v22 = vmul.f32 %v4528_v7, %v2029_v38  ;;  %v2091_v29 = vmin.f32 %v1550_v20, %v1872_v31  ;;  %v2197_v36 = vmul.f32 %v4528_v7, %v2125_v58  ;;  %v5191_v49 = vmax.f32 %v4373_v1, %v4375_v2  ;;  %v4683_v12 = vpop.f32.mrf.mxu0 }
 0x1b2   : > { %v2264_v32 = vadd.f32 %v4547_v13, %v2226_v45  ;;  %v2224_v8 = vmax.f32 %v2160_v30, %v2192_v46  ;;  %2456 = vst.msk [vmem:[%s4586_s15 + $0x28] sm:$0xf] %vm2445_vm3, %v3198_v16  ;;  %v3196_v25 = vpack.c.bf16 %v2293_v24, %v2293_v24  ;;  %v5192_v26 = vmin.f32 %v4373_v1, %v4375_v2  ;;  %v4697_v30 = vpop.f32.mrf.mxu1 }
 0x1b3   : > { %v2027_v50 = vmax.f32 %v5191_v49, %v1995_v14  ;;  %v1998_v20 = vmax.f32 %v3416_v40, %v3458_v11  ;;  %v2094_v31 = vmin.f32 %v3416_v40, %v3458_v11  ;;  %v2229_v28 = vmax.f32 %v2165_v22, %v2197_v36  ;;  %v4695_v23 = vpop.f32.mrf.mxu0 }
 0x1b4   : > { %v2123_v41 = vmin.f32 %v5192_v26, %v2091_v29  ;;  %v2296_v42 = vmax.f32 %v2264_v32, 0.0  ;;  %v2262_v27 = vadd.f32 %v4547_v13, %v2224_v8  ;;  %2454 = vst.msk [vmem:[%s4586_s15 + $0x20] sm:$0xf] %vm2445_vm3, %v3196_v25  ;;  %v5193_v1 = vmax.f32 %v4381_v5, %v4383_v6  ;;  %v4711_v16 = vpop.f32.mrf.mxu1 }
 0x1b5   : > { %v2163_v43 = vmul.f32 %v4528_v7, %v2027_v50  ;;  %v5194_v40 = vmin.f32 %v4381_v5, %v4383_v6  ;;  %v1996_v53 = vmax.f32 %v1553_v19, %v1875_v35  ;;  %v2267_v34 = vadd.f32 %v4547_v13, %v2229_v28  ;;  %v4709_v14 = vpop.f32.mrf.mxu0 }
 0x1b6   : > { %v2195_v18 = vmul.f32 %v4528_v7, %v2123_v41  ;;  %v2030_v2 = vmax.f32 %v5193_v1, %v1998_v20  ;;  %v3199_v54 = vpack.c.bf16 %v2296_v42, %v2296_v42  ;;  %v2294_v33 = vmax.f32 %v2262_v27, 0.0  ;;  %v4723_v25 = vpop.f32.mrf.mxu1 }
 0x1b7   : > { %v2126_v11 = vmin.f32 %v5194_v40, %v2094_v31  ;;  %v2092_v21 = vmin.f32 %v1553_v19, %v1875_v35  ;;  %v5195_v5 = vmax.f32 %v4389_v9, %v4391_v10  ;;  %v2299_v57 = vmax.f32 %v2267_v34, 0.0  ;;  %v4721_v50 = vpop.f32.mrf.mxu0 }
 0x1b8   : > { %v2227_v37 = vmax.f32 %v2163_v43, %v2195_v18  ;;  %v2166_v38 = vmul.f32 %v4528_v7, %v2030_v2  ;;  %2457 = vst.msk [vmem:[%s4586_s15 + $0x2c] sm:$0xf] %vm2445_vm3, %v3199_v54  ;;  %v3197_v46 = vpack.c.bf16 %v2294_v33, %v2294_v33  ;;  %v5196_v19 = vmin.f32 %v4389_v9, %v4391_v10  ;;  %v4738_v1 = vpop.f32.mrf.mxu1 }
 0x1b9   : > { %v2198_v45 = vmul.f32 %v4528_v7, %v2126_v11  ;;  %v2028_v6 = vmax.f32 %v5195_v5, %v1996_v53  ;;  %v2001_v58 = vmax.f32 %v3419_v17, %v3461_v39  ;;  %v2097_v32 = vmin.f32 %v3419_v17, %v3461_v39  ;;  %v4736_v18 = vpop.f32.mrf.mxu0 }
 0x1ba   : > { %v2124_v35 = vmin.f32 %v5196_v19, %v2092_v21  ;;  %v2265_v24 = vadd.f32 %v4547_v13, %v2227_v37  ;;  %2455 = vst.msk [vmem:[%s4586_s15 + $0x24] sm:$0xf] %vm2445_vm3, %v3197_v46  ;;  %v3202_v8 = vpack.c.bf16 %v2299_v57, %v2299_v57  ;;  %v5197_v9 = vmax.f32 %v4397_v4, %v4399_v3  ;;  %v4752_v21 = vpop.f32.mrf.mxu1 }
 0x1bb   : > { %v2230_v22 = vmax.f32 %v2166_v38, %v2198_v45  ;;  %v2164_v29 = vmul.f32 %v4528_v7, %v2028_v6  ;;  %v1999_v49 = vmax.f32 %v1566_v61, %v1888_v62  ;;  %v5198_v17 = vmin.f32 %v4397_v4, %v4399_v3  ;;  %v4750_v34 = vpop.f32.mrf.mxu0 }
 0x1bc   : > { %v2196_v36 = vmul.f32 %v4528_v7, %v2124_v35  ;;  %v2033_v10 = vmax.f32 %v5197_v9, %v2001_v58  ;;  %v2297_v26 = vmax.f32 %v2265_v24, 0.0  ;;  %v2095_v20 = vmin.f32 %v1566_v61, %v1888_v62  ;;  %2460 = vst.msk [vmem:[%s4586_s15 + $0x38] sm:$0xf] %vm2445_vm3, %v3202_v8  ;;  %v4767_v57 = vpop.f32.mrf.mxu1 }
 0x1bd   : > { %v2268_v41 = vadd.f32 %v4547_v13, %v2230_v22  ;;  %v2129_v39 = vmin.f32 %v5198_v17, %v2097_v32  ;;  %v5199_v27 = vmax.f32 %v4405_v0, %v4407_v63  ;;  %v2002_v43 = vmax.f32 %v4683_v12, %v3462_v15  ;;  %v4765_v46 = vpop.f32.mrf.mxu0 }
 0x1be   : > { %v2228_v31 = vmax.f32 %v2164_v29, %v2196_v36  ;;  %v2169_v42 = vmul.f32 %v4528_v7, %v2033_v10  ;;  %v3200_v2 = vpack.c.bf16 %v2297_v26, %v2297_v26  ;;  %v5200_v61 = vmin.f32 %v4405_v0, %v4407_v63  ;;  %v4785_v8 = vpop.f32.mrf.mxu1 }
 0x1bf   : > { %v2031_v28 = vmax.f32 %v5199_v27, %v1999_v49  ;;  %v2300_v3 = vmax.f32 %v2268_v41, 0.0  ;;  %v2201_v4 = vmul.f32 %v4528_v7, %v2129_v39  ;;  %v5201_v53 = vmax.f32 %v4413_v60, %v4415_v59  ;;  %v4783_v32 = vpop.f32.mrf.mxu0 }
 0x1c0   : > { %v2127_v62 = vmin.f32 %v5200_v61, %v2095_v20  ;;  %v2266_v40 = vadd.f32 %v4547_v13, %v2228_v31  ;;  %v2098_v33 = vmin.f32 %v4683_v12, %v3462_v15  ;;  %2458 = vst.msk [vmem:[%s4586_s15 + $0x30] sm:$0xf] %vm2445_vm3, %v3200_v2  ;;  %v2000_v38 = vmax.f32 %v4695_v23, %v4697_v30  ;;  %v4810_v2 = vpop.f32.mrf.mxu1 }
 0x1c1   : > { %v2167_v11 = vmul.f32 %v4528_v7, %v2031_v28  ;;  %v2034_v54 = vmax.f32 %v5201_v53, %v2002_v43  ;;  %v3203_v37 = vpack.c.bf16 %v2300_v3, %v2300_v3  ;;  %v2233_v63 = vmax.f32 %v2169_v42, %v2201_v4  ;;  %v4808_v43 = vpop.f32.mrf.mxu0 }
 0x1c2   : > { %v2199_v0 = vmul.f32 %v4528_v7, %v2127_v62  ;;  %v2298_v45 = vmax.f32 %v2266_v40, 0.0  ;;  %v5202_v5 = vmin.f32 %v4413_v60, %v4415_v59  ;;  %v2096_v15 = vmin.f32 %v4695_v23, %v4697_v30 }
 0x1c3   : > { %v2170_v12 = vmul.f32 %v4528_v7, %v2034_v54  ;;  %2461 = vst.msk [vmem:[%s4586_s15 + $0x3c] sm:$0xf] %vm2445_vm3, %v3203_v37  ;;  %v2271_v19 = vadd.f32 %v4547_v13, %v2233_v63  ;;  %v5203_v58 = vmax.f32 %v4421_v56, %v4423_v55  ;;  %v2005_v60 = vmax.f32 %v4709_v14, %v4711_v16 }
 0x1c4   : > { %v2130_v6 = vmin.f32 %v5202_v5, %v2098_v33  ;;  %v2231_v35 = vmax.f32 %v2167_v11, %v2199_v0  ;;  %v3201_v24 = vpack.c.bf16 %v2298_v45, %v2298_v45  ;;  %v5204_v30 = vmin.f32 %v4421_v56, %v4423_v55  ;;  %v1601_v5 = vpop.f32.mrf.mxu0 }
 0x1c5   : > { %v2032_v59 = vmax.f32 %v5203_v58, %v2000_v38  ;;  %v2101_v29 = vmin.f32 %v4709_v14, %v4711_v16  ;;  %v2303_v36 = vmax.f32 %v2271_v19, 0.0  ;;  %v5205_v49 = vmax.f32 %v4429_v52, %v4431_v51 }
 0x1c6   : > { %v2202_v23 = vmul.f32 %v4528_v7, %v2130_v6  ;;  %v2128_v22 = vmin.f32 %v5204_v30, %v2096_v15  ;;  %v2269_v9 = vadd.f32 %v4547_v13, %v2231_v35  ;;  %2459 = vst.msk [vmem:[%s4586_s15 + $0x34] sm:$0xf] %vm2445_vm3, %v3201_v24  ;;  %v5206_v14 = vmin.f32 %v4429_v52, %v4431_v51  ;;  %v1923_v6 = vpop.f32.mrf.mxu1  ;;  %v5213_v35 = vld [vmem:[#allocation6_spill] sm:$0xff] }
 0x1c7   : > { %v2168_v10 = vmul.f32 %v4528_v7, %v2032_v59  ;;  %v2037_v26 = vmax.f32 %v5205_v49, %v2005_v60  ;;  %v2003_v41 = vmax.f32 %v4721_v50, %v4723_v25  ;;  %v3206_v17 = vpack.c.bf16 %v2303_v36, %v2303_v36  ;;  %v5216_v49 = vld [vmem:[#allocation7_spill] sm:$0xff] }
 0x1c8   : > { %v2234_v55 = vmax.f32 %v2170_v12, %v2202_v23  ;;  %v2200_v56 = vmul.f32 %v4528_v7, %v2128_v22  ;;  %v2133_v16 = vmin.f32 %v5206_v14, %v2101_v29  ;;  %v2301_v39 = vmax.f32 %v2269_v9, 0.0 }
 0x1c9   : > { %v2173_v20 = vmul.f32 %v4528_v7, %v2037_v26  ;;  %v2099_v31 = vmin.f32 %v4721_v50, %v4723_v25  ;;  %v5207_v51 = vmax.f32 %v4437_v48, %v4439_v47  ;;  %2464 = vst.msk [vmem:[%s4586_s15 + $0x48] sm:$0xf] %vm2445_vm3, %v3206_v17  ;;  %v5208_v50 = vmin.f32 %v4437_v48, %v4439_v47  ;;  %v5209_v47 = vld [vmem:[#allocation4_spill] sm:$0xff] }
 0x1ca   : > { %v2272_v42 = vadd.f32 %v4547_v13, %v2234_v55  ;;  %v2232_v27 = vmax.f32 %v2168_v10, %v2200_v56  ;;  %v2205_v28 = vmul.f32 %v4528_v7, %v2133_v16  ;;  %v3204_v3 = vpack.c.bf16 %v2301_v39, %v2301_v39  ;;  %v5217_v26 = vld [vmem:[#allocation8_spill] sm:$0xff]  ;;  %v3431_v16 = vpop.f32.mrf.mxu0 }
 0x1cb   : > { %v2035_v52 = vmax.f32 %v5207_v51, %v2003_v41  ;;  %v2131_v25 = vmin.f32 %v5208_v50, %v2099_v31  ;;  %v2006_v4 = vmax.f32 %v4736_v18, %v4738_v1  ;;  %v2102_v61 = vmin.f32 %v4736_v18, %v4738_v1  ;;  %v3473_v41 = vpop.f32.mrf.mxu1 }
 0x1cc   : > { %v2304_v62 = vmax.f32 %v2272_v42, 0.0  ;;  %v2270_v40 = vadd.f32 %v4547_v13, %v2232_v27  ;;  %v2237_v11 = vmax.f32 %v2173_v20, %v2205_v28  ;;  %2462 = vst.msk [vmem:[%s4586_s15 + $0x40] sm:$0xf] %vm2445_vm3, %v3204_v3  ;;  %v5210_v48 = vmax.f32 %v4445_v44, %v5209_v47  ;;  %v5220_v27 = vld [vmem:[#allocation9_spill] sm:$0xff]  ;;  %v5221_v28 = vld [vmem:[#allocation10_spill] sm:$0xff] }
 0x1cd   : > { %v2171_v53 = vmul.f32 %v4528_v7, %v2035_v52  ;;  %v2203_v54 = vmul.f32 %v4528_v7, %v2131_v25  ;;  %v5211_v37 = vmin.f32 %v4445_v44, %v5209_v47  ;;  %v2004_v18 = vmax.f32 %v4750_v34, %v4752_v21  ;;  %v5212_v44 = vld [vmem:[#allocation5_spill] sm:$0xff] }
 0x1ce   : > { %v2038_v33 = vmax.f32 %v5210_v48, %v2006_v4  ;;  %v3207_v1 = vpack.c.bf16 %v2304_v62, %v2304_v62  ;;  %v2302_v0 = vmax.f32 %v2270_v40, 0.0  ;;  %v2275_v38 = vadd.f32 %v4547_v13, %v2237_v11  ;;  %v5224_v40 = vld [vmem:[#allocation11_spill] sm:$0xff]  ;;  %v5225_v11 = vld [vmem:[#allocation12_spill] sm:$0xff]  ;;  %v1614_v48 = vpop.f32.mrf.mxu0 }
 0x1cf   : > { %v2134_v63 = vmin.f32 %v5211_v37, %v2102_v61  ;;  %v2100_v45 = vmin.f32 %v4750_v34, %v4752_v21  ;;  %v2235_v12 = vmax.f32 %v2171_v53, %v2203_v54  ;;  %v5214_v58 = vmax.f32 %v5212_v44, %v5213_v35 }
 0x1d0   : > { %v2174_v15 = vmul.f32 %v4528_v7, %v2038_v33  ;;  %2465 = vst.msk [vmem:[%s4586_s15 + $0x4c] sm:$0xf] %vm2445_vm3, %v3207_v1  ;;  %v3205_v60 = vpack.c.bf16 %v2302_v0, %v2302_v0  ;;  %v2307_v24 = vmax.f32 %v2275_v38, 0.0  ;;  %v5215_v23 = vmin.f32 %v5212_v44, %v5213_v35  ;;  %v1936_v33 = vpop.f32.mrf.mxu1  ;;  %v5229_v44 = vld [vmem:[#allocation14_spill] sm:$0xff] }
 0x1d1   : > { %v2206_v19 = vmul.f32 %v4528_v7, %v2134_v63  ;;  %v2036_v59 = vmax.f32 %v5214_v58, %v2004_v18  ;;  %v2009_v21 = vmax.f32 %v4765_v46, %v4767_v57  ;;  %v2273_v30 = vadd.f32 %v4547_v13, %v2235_v12 }
 0x1d2   : > { %v2132_v34 = vmin.f32 %v5215_v23, %v2100_v45  ;;  %v2105_v36 = vmin.f32 %v4765_v46, %v4767_v57  ;;  %2463 = vst.msk [vmem:[%s4586_s15 + $0x44] sm:$0xf] %vm2445_vm3, %v3205_v60  ;;  %v3210_v9 = vpack.c.bf16 %v2307_v24, %v2307_v24  ;;  %v5218_v55 = vmax.f32 %v5216_v49, %v5217_v26 }
 0x1d3   : > { %v2238_v22 = vmax.f32 %v2174_v15, %v2206_v19  ;;  %v2172_v29 = vmul.f32 %v4528_v7, %v2036_v59  ;;  %v2007_v14 = vmax.f32 %v4783_v32, %v4785_v8  ;;  %v2305_v17 = vmax.f32 %v2273_v30, 0.0  ;;  %v5228_v19 = vld [vmem:[#allocation13_spill] sm:$0xff] }
 0x1d4   : > { %v2204_v10 = vmul.f32 %v4528_v7, %v2132_v34  ;;  %v2041_v56 = vmax.f32 %v5218_v55, %v2009_v21  ;;  %v5219_v46 = vmin.f32 %v5216_v49, %v5217_v26  ;;  %v2103_v20 = vmin.f32 %v4783_v32, %v4785_v8  ;;  %2468 = vst.msk [vmem:[%s4586_s15 + $0x58] sm:$0xf] %vm2445_vm3, %v3210_v9  ;;  %v5233_v9 = vld [vmem:[#allocation16_spill] sm:$0xff] }
 0x1d5   : > { %v2276_v39 = vadd.f32 %v4547_v13, %v2238_v22  ;;  %v5222_v51 = vmax.f32 %v5220_v27, %v5221_v28  ;;  %v2010_v3 = vmax.f32 %v4808_v43, %v4810_v2  ;;  %v3208_v50 = vpack.c.bf16 %v2305_v17, %v2305_v17 }
 0x1d6   : > { %v2137_v57 = vmin.f32 %v5219_v46, %v2105_v36  ;;  %v2236_v31 = vmax.f32 %v2172_v29, %v2204_v10  ;;  %v2177_v42 = vmul.f32 %v4528_v7, %v2041_v56  ;;  %v5223_v32 = vmin.f32 %v5220_v27, %v5221_v28  ;;  %v5232_v36 = vld [vmem:[#allocation15_spill] sm:$0xff]  ;;  %v5237_v27 = vld [vmem:[#allocation18_spill] sm:$0xff] }
 0x1d7   : > { %v2039_v52 = vmax.f32 %v5222_v51, %v2007_v14  ;;  %v2308_v25 = vmax.f32 %v2276_v39, 0.0  ;;  %v5226_v53 = vmax.f32 %v5224_v40, %v5225_v11  ;;  %v2106_v47 = vmin.f32 %v4808_v43, %v4810_v2  ;;  %2466 = vst.msk [vmem:[%s4586_s15 + $0x50] sm:$0xf] %vm2445_vm3, %v3208_v50 }
 0x1d8   : > { %v2209_v4 = vmul.f32 %v4528_v7, %v2137_v57  ;;  %v2135_v8 = vmin.f32 %v5223_v32, %v2103_v20  ;;  %v2274_v61 = vadd.f32 %v4547_v13, %v2236_v31  ;;  %v2008_v1 = vmax.f32 %v1601_v5, %v1923_v6 }
 0x1d9   : > { %v2175_v62 = vmul.f32 %v4528_v7, %v2039_v52  ;;  %v2042_v54 = vmax.f32 %v5226_v53, %v2010_v3  ;;  %v3211_v37 = vpack.c.bf16 %v2308_v25, %v2308_v25  ;;  %v5227_v38 = vmin.f32 %v5224_v40, %v5225_v11 }
 0x1da   : > { %v2241_v63 = vmax.f32 %v2177_v42, %v2209_v4  ;;  %v2207_v18 = vmul.f32 %v4528_v7, %v2135_v8  ;;  %v2306_v0 = vmax.f32 %v2274_v61, 0.0  ;;  %v2104_v15 = vmin.f32 %v1601_v5, %v1923_v6  ;;  %v3432_v5 = vpop.f32.mrf.mxu0  ;;  %v3474_v6 = vpop.f32.mrf.mxu1  ;;  %v5236_v42 = vld [vmem:[#allocation17_spill] sm:$0xff] }
 0x1db   : > { %v2138_v45 = vmin.f32 %v5227_v38, %v2106_v47  ;;  %v2178_v12 = vmul.f32 %v4528_v7, %v2042_v54  ;;  %2469 = vst.msk [vmem:[%s4586_s15 + $0x5c] sm:$0xf] %vm2445_vm3, %v3211_v37  ;;  %v5230_v35 = vmax.f32 %v5228_v19, %v5229_v44  ;;  %v2013_v59 = vmax.f32 %v3431_v16, %v3473_v41  ;;  %v5240_v54 = vld [vmem:[#allocation19_spill] sm:$0xff]  ;;  %v5241_v47 = vld [vmem:[#allocation20_spill] sm:$0xff] }
 0x1dc   : > { %v2279_v43 = vadd.f32 %v4547_v13, %v2241_v63  ;;  %v2239_v2 = vmax.f32 %v2175_v62, %v2207_v18  ;;  %v3209_v60 = vpack.c.bf16 %v2306_v0, %v2306_v0  ;;  %v5231_v23 = vmin.f32 %v5228_v19, %v5229_v44  ;;  %v1617_v52 = vpop.f32.mrf.mxu0  ;;  %v1939_v3 = vpop.f32.mrf.mxu1  ;;  %v5245_v19 = vld [vmem:[#allocation22_spill] sm:$0xff] }
 0x1dd   : > { %v2040_v58 = vmax.f32 %v5230_v35, %v2008_v1  ;;  %v2210_v24 = vmul.f32 %v4528_v7, %v2138_v45  ;;  %v2109_v21 = vmin.f32 %v3431_v16, %v3473_v41  ;;  %v5234_v10 = vmax.f32 %v5232_v36, %v5233_v9 }
 0x1de   : > { %v2136_v34 = vmin.f32 %v5231_v23, %v2104_v15  ;;  %v2311_v30 = vmax.f32 %v2279_v43, 0.0  ;;  %v2277_v22 = vadd.f32 %v4547_v13, %v2239_v2  ;;  %2467 = vst.msk [vmem:[%s4586_s15 + $0x54] sm:$0xf] %vm2445_vm3, %v3209_v60  ;;  %v5235_v56 = vmin.f32 %v5232_v36, %v5233_v9  ;;  %v5244_v2 = vld [vmem:[#allocation21_spill] sm:$0xff] }
 0x1df   : > { %v2176_v29 = vmul.f32 %v4528_v7, %v2040_v58  ;;  %v2045_v49 = vmax.f32 %v5234_v10, %v2013_v59  ;;  %v2242_v26 = vmax.f32 %v2178_v12, %v2210_v24  ;;  %v2011_v16 = vmax.f32 %v1614_v48, %v1936_v33 }
 0x1e0   : > { %v2208_v55 = vmul.f32 %v4528_v7, %v2136_v34  ;;  %v2141_v14 = vmin.f32 %v5235_v56, %v2109_v21  ;;  %v3214_v41 = vpack.c.bf16 %v2311_v30, %v2311_v30  ;;  %v2309_v17 = vmax.f32 %v2277_v22, 0.0 }
 0x1e1   : > { %v2181_v39 = vmul.f32 %v4528_v7, %v2045_v49  ;;  %v2107_v46 = vmin.f32 %v1614_v48, %v1936_v33  ;;  %v2280_v57 = vadd.f32 %v4547_v13, %v2242_v26  ;;  %v5238_v28 = vmax.f32 %v5236_v42, %v5237_v27 }
 0x1e2   : > { %v2240_v20 = vmax.f32 %v2176_v29, %v2208_v55  ;;  %v2213_v31 = vmul.f32 %v4528_v7, %v2141_v14  ;;  %2472 = vst.msk [vmem:[%s4586_s15 + $0x68] sm:$0xf] %vm2445_vm3, %v3214_v41  ;;  %v3212_v50 = vpack.c.bf16 %v2309_v17, %v2309_v17  ;;  %v5239_v25 = vmin.f32 %v5236_v42, %v5237_v27 }
 0x1e3   : > { %v2043_v51 = vmax.f32 %v5238_v28, %v2011_v16  ;;  %v2014_v32 = vmax.f32 %v3432_v5, %v3474_v6  ;;  %v2110_v8 = vmin.f32 %v3432_v5, %v3474_v6  ;;  %v2312_v61 = vmax.f32 %v2280_v57, 0.0 }
 0x1e4   : > { %v2139_v4 = vmin.f32 %v5239_v25, %v2107_v46  ;;  %v2278_v62 = vadd.f32 %v4547_v13, %v2240_v20  ;;  %v2245_v40 = vmax.f32 %v2181_v39, %v2213_v31  ;;  %2470 = vst.msk [vmem:[%s4586_s15 + $0x60] sm:$0xf] %vm2445_vm3, %v3212_v50  ;;  %v5242_v48 = vmax.f32 %v5240_v54, %v5241_v47 }
 0x1e5   : > { %v2179_v11 = vmul.f32 %v4528_v7, %v2043_v51  ;;  %v5243_v37 = vmin.f32 %v5240_v54, %v5241_v47  ;;  %v2012_v18 = vmax.f32 %v1617_v52, %v1939_v3  ;;  %v3215_v1 = vpack.c.bf16 %v2312_v61, %v2312_v61 }
 0x1e6   : > { %v2211_v53 = vmul.f32 %v4528_v7, %v2139_v4  ;;  %v2046_v33 = vmax.f32 %v5242_v48, %v2014_v32  ;;  %v2310_v0 = vmax.f32 %v2278_v62, 0.0  ;;  %v2283_v38 = vadd.f32 %v4547_v13, %v2245_v40 }
 0x1e7   : > { %v2142_v63 = vmin.f32 %v5243_v37, %v2110_v8  ;;  %v2108_v45 = vmin.f32 %v1617_v52, %v1939_v3  ;;  %v5246_v44 = vmax.f32 %v5244_v2, %v5245_v19  ;;  %2473 = vst.msk [vmem:[%s4586_s15 + $0x6c] sm:$0xf] %vm2445_vm3, %v3215_v1  ;;  %v5247_v60 = vmin.f32 %v5244_v2, %v5245_v19 }
 0x1e8   : > { %v2243_v12 = vmax.f32 %v2179_v11, %v2211_v53  ;;  %v2182_v15 = vmul.f32 %v4528_v7, %v2046_v33  ;;  %v3213_v58 = vpack.c.bf16 %v2310_v0, %v2310_v0  ;;  %v2315_v59 = vmax.f32 %v2283_v38, 0.0 }
 0x1e9   : > { %v2214_v43 = vmul.f32 %v4528_v7, %v2142_v63  ;;  %v2044_v35 = vmax.f32 %v5246_v44, %v2012_v18  ;;  %v2140_v24 = vmin.f32 %v5247_v60, %v2108_v45 }
 0x1ea   : > { %v2281_v23 = vadd.f32 %v4547_v13, %v2243_v12  ;;  %2471 = vst.msk [vmem:[%s4586_s15 + $0x64] sm:$0xf] %vm2445_vm3, %v3213_v58  ;;  %v3218_v5 = vpack.c.bf16 %v2315_v59, %v2315_v59 }
 0x1eb   : > { %v2246_v34 = vmax.f32 %v2182_v15, %v2214_v43  ;;  %v2180_v21 = vmul.f32 %v4528_v7, %v2044_v35  ;;  %v2212_v6 = vmul.f32 %v4528_v7, %v2140_v24 }
 0x1ec   : > { %v2313_v30 = vmax.f32 %v2281_v23, 0.0  ;;  %2476 = vst.msk [vmem:[%s4586_s15 + $0x78] sm:$0xf] %vm2445_vm3, %v3218_v5 }
 0x1ed   : > { %v2284_v22 = vadd.f32 %v4547_v13, %v2246_v34  ;;  %v2244_v29 = vmax.f32 %v2180_v21, %v2212_v6 }
 0x1ee   : > { %v3216_v36 = vpack.c.bf16 %v2313_v30, %v2313_v30 }
 0x1ef   : > { %v2316_v9 = vmax.f32 %v2284_v22, 0.0  ;;  %v2282_v10 = vadd.f32 %v4547_v13, %v2244_v29 }
 0x1f0   : > { %2474 = vst.msk [vmem:[%s4586_s15 + $0x70] sm:$0xf] %vm2445_vm3, %v3216_v36 }
 0x1f1   : > { %v3219_v49 = vpack.c.bf16 %v2316_v9, %v2316_v9  ;;  %v2314_v26 = vmax.f32 %v2282_v10, 0.0  ;;  %2484 = sbr.rel (!%p3906_p5) target bundleno = 562 (0x232), region = 102 }
 0x1f3   : > { %2477 = vst.msk [vmem:[%s4586_s15 + $0x7c] sm:$0xf] %vm2445_vm3, %v3219_v49  ;;  %v3217_v55 = vpack.c.bf16 %v2314_v26, %v2314_v26 }
 0x1f5   : > { %2475 = vst.msk [vmem:[%s4586_s15 + $0x74] sm:$0xf] %vm2445_vm3, %v3217_v55 }
 0x1f6   : > { %s5261_s6 = smov (!%p2487_p4, %s2486_s6), 32 }
 0x1f7   : > { %s3170_s10 = sshll.u32 %s5261_s6, 6 }
 0x1f8   : > { %p3173_p6 = scmp.eq.s32.totalorder %s3170_s10, 0 }
 0x1f9   : > { %s4975_s23 = sshrl.u32 (!%p3173_p6), %s5261_s6, 5 }
 0x1fa   : > { %2495 = sbr.rel (%p3173_p6) target bundleno = 562 (0x232), region = 106  ;;  %p3174_p5 = scmp.le.s32.totalorder (!%p3173_p6), %s4975_s23, 0 }
 0x1ff   : > { %2840 = sbr.rel (%p3174_p5) target bundleno = 545 (0x221), region = 222  ;;  %s5248_s18 = smov (!%p3174_p5), %s4969_s9 }
 0x200   : > { %s5249_s17 = smov (!%p3174_p5), %s4586_s15  ;;  %s4984_s11 = smov (!%p3174_p5), 0  }
 0x201   : > { %s4986_s12 = smov (!%p3174_p5), 0  }
 0x204 LB: >> { %v2512_v7 = vld [vmem:[%s3823_s17] sm:$0xf]  ;;  %v2514_v13 = vld [vmem:[%s3823_s17 + $0x4] sm:$0xf]  ;;  %v2516_v56 = vld [vmem:[%s3823_s17 + $0x8] sm:$0xf]  ;;  %s3831_s12 = sphi %s4986_s12, %s2506_s12   ;;  %s3827_s11 = sphi %s4984_s11, %s5250_s11   ;;  %s3823_s17 = sphi %s5249_s17, %s2581_s17   ;;  %s3819_s18 = sphi %s5248_s18, %s2582_s18  }
 0x205   : >> { %2513 = vst [vmem:[%s3819_s18] sm:$0xf] %v2512_v7  ;;  %2515 = vst [vmem:[%s3819_s18 + $0x4] sm:$0xf] %v2514_v13  ;;  %v2518_v14 = vld [vmem:[%s3823_s17 + $0xc] sm:$0xf]  ;;  %s2576_s13 = sadd.s32 1, %s3827_s11 }
 0x206   : >> { %2517 = vst [vmem:[%s3819_s18 + $0x8] sm:$0xf] %v2516_v56  ;;  %v2520_v16 = vld [vmem:[%s3823_s17 + $0x10] sm:$0xf]  ;;  %v2522_v41 = vld [vmem:[%s3823_s17 + $0x14] sm:$0xf]  ;;  %p2577_p7 = scmp.ge.s32.totalorder %s2576_s13, %s4975_s23 }
 0x207   : >> { %2519 = vst [vmem:[%s3819_s18 + $0xc] sm:$0xf] %v2518_v14  ;;  %2521 = vst [vmem:[%s3819_s18 + $0x10] sm:$0xf] %v2520_v16  ;;  %v2524_v17 = vld [vmem:[%s3823_s17 + $0x18] sm:$0xf] }
 0x208   : >> { %2523 = vst [vmem:[%s3819_s18 + $0x14] sm:$0xf] %v2522_v41  ;;  %v2526_v39 = vld [vmem:[%s3823_s17 + $0x1c] sm:$0xf]  ;;  %v2528_v46 = vld [vmem:[%s3823_s17 + $0x20] sm:$0xf] }
 0x209   : >> { %2525 = vst [vmem:[%s3819_s18 + $0x18] sm:$0xf] %v2524_v17  ;;  %2527 = vst [vmem:[%s3819_s18 + $0x1c] sm:$0xf] %v2526_v39  ;;  %v2530_v57 = vld [vmem:[%s3823_s17 + $0x24] sm:$0xf] }
 0x20a   : >> { %2529 = vst [vmem:[%s3819_s18 + $0x20] sm:$0xf] %v2528_v46  ;;  %v2532_v20 = vld [vmem:[%s3823_s17 + $0x28] sm:$0xf]  ;;  %v2534_v31 = vld [vmem:[%s3823_s17 + $0x2c] sm:$0xf] }
 0x20b   : >> { %2531 = vst [vmem:[%s3819_s18 + $0x24] sm:$0xf] %v2530_v57  ;;  %2533 = vst [vmem:[%s3819_s18 + $0x28] sm:$0xf] %v2532_v20  ;;  %v2536_v42 = vld [vmem:[%s3823_s17 + $0x30] sm:$0xf] }
 0x20c   : >> { %2535 = vst [vmem:[%s3819_s18 + $0x2c] sm:$0xf] %v2534_v31  ;;  %v2538_v27 = vld [vmem:[%s3823_s17 + $0x34] sm:$0xf]  ;;  %v2540_v28 = vld [vmem:[%s3823_s17 + $0x38] sm:$0xf] }
 0x20d   : >> { %2537 = vst [vmem:[%s3819_s18 + $0x30] sm:$0xf] %v2536_v42  ;;  %2539 = vst [vmem:[%s3819_s18 + $0x34] sm:$0xf] %v2538_v27  ;;  %v2542_v51 = vld [vmem:[%s3823_s17 + $0x3c] sm:$0xf] }
 0x20e   : >> { %2541 = vst [vmem:[%s3819_s18 + $0x38] sm:$0xf] %v2540_v28  ;;  %v2544_v52 = vld [vmem:[%s3823_s17 + $0x40] sm:$0xf]  ;;  %v2546_v3 = vld [vmem:[%s3823_s17 + $0x44] sm:$0xf] }
 0x20f   : >> { %2543 = vst [vmem:[%s3819_s18 + $0x3c] sm:$0xf] %v2542_v51  ;;  %2545 = vst [vmem:[%s3819_s18 + $0x40] sm:$0xf] %v2544_v52  ;;  %v2548_v50 = vld [vmem:[%s3823_s17 + $0x48] sm:$0xf] }
 0x210   : >> { %2547 = vst [vmem:[%s3819_s18 + $0x44] sm:$0xf] %v2546_v3  ;;  %v2550_v25 = vld [vmem:[%s3823_s17 + $0x4c] sm:$0xf]  ;;  %v2552_v4 = vld [vmem:[%s3823_s17 + $0x50] sm:$0xf] }
 0x211   : >> { %2549 = vst [vmem:[%s3819_s18 + $0x48] sm:$0xf] %v2548_v50  ;;  %2551 = vst [vmem:[%s3819_s18 + $0x4c] sm:$0xf] %v2550_v25  ;;  %v2554_v32 = vld [vmem:[%s3823_s17 + $0x54] sm:$0xf] }
 0x212   : >> { %2553 = vst [vmem:[%s3819_s18 + $0x50] sm:$0xf] %v2552_v4  ;;  %v2556_v8 = vld [vmem:[%s3823_s17 + $0x58] sm:$0xf]  ;;  %v2558_v61 = vld [vmem:[%s3823_s17 + $0x5c] sm:$0xf] }
 0x213   : >> { %2555 = vst [vmem:[%s3819_s18 + $0x54] sm:$0xf] %v2554_v32  ;;  %2557 = vst [vmem:[%s3819_s18 + $0x58] sm:$0xf] %v2556_v8  ;;  %v2560_v62 = vld [vmem:[%s3823_s17 + $0x60] sm:$0xf] }
 0x214   : >> { %2559 = vst [vmem:[%s3819_s18 + $0x5c] sm:$0xf] %v2558_v61  ;;  %v2562_v40 = vld [vmem:[%s3823_s17 + $0x64] sm:$0xf]  ;;  %v2564_v11 = vld [vmem:[%s3823_s17 + $0x68] sm:$0xf] }
 0x215   : >> { %2561 = vst [vmem:[%s3819_s18 + $0x60] sm:$0xf] %v2560_v62  ;;  %2563 = vst [vmem:[%s3819_s18 + $0x64] sm:$0xf] %v2562_v40  ;;  %v2566_v53 = vld [vmem:[%s3823_s17 + $0x6c] sm:$0xf] }
 0x216   : >> { %2565 = vst [vmem:[%s3819_s18 + $0x68] sm:$0xf] %v2564_v11  ;;  %v2568_v54 = vld [vmem:[%s3823_s17 + $0x70] sm:$0xf]  ;;  %v2570_v47 = vld [vmem:[%s3823_s17 + $0x74] sm:$0xf] }
 0x217   : >> { %2567 = vst [vmem:[%s3819_s18 + $0x6c] sm:$0xf] %v2566_v53  ;;  %2569 = vst [vmem:[%s3819_s18 + $0x70] sm:$0xf] %v2568_v54  ;;  %v2572_v48 = vld [vmem:[%s3823_s17 + $0x78] sm:$0xf] }
 0x218   : >> { %2571 = vst [vmem:[%s3819_s18 + $0x74] sm:$0xf] %v2570_v47  ;;  %v2574_v33 = vld [vmem:[%s3823_s17 + $0x7c] sm:$0xf]  ;;  %2573 = vst [vmem:[%s3819_s18 + $0x78] sm:$0xf] %v2572_v48 }
 0x219   : >> { %2575 = vst [vmem:[%s3819_s18 + $0x7c] sm:$0xf] %v2574_v33  ;;  %s5263_s13 = smov (%p2577_p7, %s2576_s13), 0  ;;  %s2506_s12 = sadd.s32 1, %s3831_s12  }
 0x21a   : >> { %s3175_s14 = sshll.u32 %s5263_s13, 7  ;;  %p2505_p8 = scmp.ge.s32.totalorder %s2506_s12, %s4975_s23 }
 0x21b   : >> { %s2581_s17 = scalar_lea.vmem %s4586_s15, %s3175_s14 [#allocation3]   ;;  %s2582_s18 = scalar_lea.vmem %s4969_s9, %s3175_s14  }
 0x21c   : >> { %s5250_s11 = smov %s5263_s13  ;;  %2508 = sbr.rel (!%p2505_p8) target bundleno = 516 (0x204), region = 228 }
 0x221 PF: > { %s5079_s20 = sand.u32 31, %s5261_s6   ;;  %s3221_s21 = sshll.u32 %s4975_s23, 7 }
 0x222   : > { %s2587_s24 = scalar_lea.vmem %s4586_s15, %s3221_s21 [#allocation3]   ;;  %s2589_s25 = scalar_lea.vmem %s4969_s9, %s3221_s21  }
 0x223   : > { %p3180_p9 = scmp.le.s32.totalorder %s5079_s20, 0 }
 0x224   : > { %s3833_s26 = smov (!%p3180_p9), %s2589_s25   ;;  %s3837_s28 = smov (!%p3180_p9), %s2587_s24  }
 0x225   : > { %2854 = sbr.rel (%p3180_p9) target bundleno = 562 (0x232), region = 233  ;;  %s3841_s29 = smov (!%p3180_p9), 0  }
 0x226   : > { %s3845_s30 = smov (!%p3180_p9), 0  }
 0x22a LB: >> { %v2599_v37 = vld [vmem:[%s3839_s28] sm:$0xf]  ;;  %s2601_s27 = sadd.s32 1, %s3843_s29  ;;  %s2593_s30 = sadd.s32 1, %s3847_s30   ;;  %s3847_s30 = sphi %s3845_s30, %s2593_s30   ;;  %s3843_s29 = sphi %s3841_s29, %s3842_s29   ;;  %s3839_s28 = sphi %s3837_s28, %s2606_s28   ;;  %s3835_s26 = sphi %s3833_s26, %s2607_s26  }
 0x22b   : >> { %2600 = vst [vmem:[%s3835_s26] sm:$0xf] %v2599_v37  ;;  %p2602_p10 = scmp.ge.s32.totalorder %s2601_s27, %s5079_s20  ;;  %p2592_p11 = scmp.ge.s32.totalorder %s2593_s30, %s5079_s20 }
 0x22d   : >> { %s5265_s27 = smov (%p2602_p10, %s2601_s27), 0  ;;  %2595 = sbr.rel (!%p2592_p11) target bundleno = 554 (0x22a), region = 239 }
 0x22e   : >> { %s3181_s15 = sshll.u32 %s5265_s27, 2  ;;  %s3842_s29 = smov %s5265_s27  }
 0x22f   : >> { %s2606_s28 = scalar_lea.vmem %s2587_s24, %s3181_s15 [#allocation3]   ;;  %s2607_s26 = scalar_lea.vmem %s2589_s25, %s3181_s15  }
 0x232 PF: > { %p11_p12 = scmp.ge.s32.totalorder %s3894_s19, 4   ;;  %s5251_s15 = smov %s3779_s16 }
 0x233   : > { %s5252_s16 = smov %s3904_s22  ;;  %s5253_s17 = smov %s3894_s19 }
 0x234   :  { %13 = sbr.rel (!%p11_p12) target bundleno = 2 (0x2), region = 250 }

// kernel: lenet5_forward.4
= control target key start
LH: loop header
LB: loop body
LE: loop exit
PB: predicated region body
PF: predicated region fallthrough
CT: control target
= control target key end

     0   :  { %v849_v0 = vmov 0   ;;  %vm134_vm0 = vcmask 179200   ;;  %vm147_vm1 = vcmask 1042432   ;;  %vm686_vm2 = vcmask 125952   ;;  %s1203_s1 = inlined_call_operand.vmem [shape: bf16[150,16], index: 1, kind: input, shape index: {}]   ;;  %s1204_s0 = inlined_call_operand.vmem [shape: bf16[4,50,150], index: 0, kind: input, shape index: {}]   ;;  %s1205_s2 = inlined_call_operand.vmem [shape: f32[1,16], index: 2, kind: input, shape index: {}]   ;;  %s1206_s3 = inlined_call_operand.vmem [shape: f32[1,16], index: 3, kind: input, shape index: {}]   ;;  %s1207_s4 = inlined_call_operand.vmem [shape: bf16[50,16], index: 4, kind: output, shape index: {}]  }
   0x1   :  { %151 = vmatprep.subr.bf16.mxu0 %v849_v0  ;;  %268 = vmatprep.subr.bf16.mxu1 %v849_v0  ;;  %v880_v1 = vld [vmem:[%s1203_s1 + $0x38] sm:$0xff]   ;;  %v887_v2 = vld [vmem:[%s1203_s1 + $0x30] sm:$0xff]   ;;  %v896_v3 = vld [vmem:[%s1203_s1 + $0x28] sm:$0xff]   ;;  %vm693_vm3 = vcmask 122880  }
   0x2   :  { %152 = vmatpush1.bf16.msra.mxu0 %v880_v1  ;;  %269 = vmatpush1.bf16.msra.mxu1 %v880_v1  ;;  %v905_v4 = vld [vmem:[%s1203_s1 + $0x20] sm:$0xff]   ;;  %v921_v7 = vld [vmem:[%s1203_s1 + $0x18] sm:$0xff]   ;;  %v931_v8 = vld [vmem:[%s1203_s1 + $0x10] sm:$0xff]  }
   0x3   :  { %153 = vmatprep.subr.bf16.mxu0 %v849_v0  ;;  %270 = vmatprep.subr.bf16.mxu1 %v849_v0  ;;  %v807_v5 = vld [vmem:[%s1204_s0 + $0x4] ss:$8 sps:$4 sm:$0xff]   ;;  %v803_v11 = vld [vmem:[%s1203_s1 + $0x48] ss:$0 sps:$4 sm:$0x77]  }
   0x4   :  { %717 = vmatprep.mubr.msk.bf16.mxu0 %vm134_vm0, %v807_v5  ;;  %v810_v6 = vld [vmem:[%s1204_s0 + $0x3c] ss:$8 sps:$4 sm:$0xff]   ;;  %v940_v9 = vld [vmem:[%s1203_s1 + $0x8] sm:$0xff]   ;;  %v960_v12 = vsel %vm147_vm1, %v803_v11, 0  ;;  %v808_v15 = vld [vmem:[%s1204_s0 + $0x38] ss:$8 sps:$4 sm:$0xff]  }
   0x5   :  { %736 = vmatprep.mubr.msk.bf16.mxu1 %vm134_vm0, %v810_v6  ;;  %v949_v10 = vld [vmem:[%s1203_s1] sm:$0xff]   ;;  %v811_v16 = vld [vmem:[%s1204_s0 + $0x14] ss:$8 sps:$4 sm:$0xff]   ;;  %v815_v18 = vld [vmem:[%s1204_s0 + $0x10] ss:$8 sps:$4 sm:$0xff]  }
   0x6   :  { %154 = vmatpush1.bf16.msra.mxu0 %v887_v2  ;;  %271 = vmatpush1.bf16.msra.mxu1 %v887_v2  ;;  %v967_v13 = vld [vmem:[%s1203_s1 + $0x40] sm:$0xff]   ;;  %v813_v17 = vld [vmem:[%s1204_s0 + $0x4c] ss:$8 sps:$4 sm:$0xff]   ;;  %v816_v19 = vld [vmem:[%s1204_s0 + $0x48] ss:$8 sps:$4 sm:$0xff]  }
   0x7   :  { %155 = vmatprep.subr.bf16.mxu0 %v849_v0  ;;  %272 = vmatprep.subr.bf16.mxu1 %v849_v0  ;;  %v805_v14 = vld [vmem:[%s1204_s0] ss:$8 sps:$4 sm:$0xff]   ;;  %v817_v20 = vld [vmem:[%s1204_s0 + $0x24] ss:$8 sps:$4 sm:$0xff]   ;;  %v43_v24 = vld [vmem:[%s1204_s0 + $0x30] sm:$0x11] }
   0x8   :  { %v819_v21 = vld [vmem:[%s1204_s0 + $0x5c] ss:$8 sps:$4 sm:$0xff]   ;;  %v821_v22 = vld [vmem:[%s1204_s0 + $0x20] ss:$8 sps:$4 sm:$0xff]   ;;  %v706_v26 = vcombine.high %v43_v24, %v43_v24  ;;  %v705_v28 = vcombine.low %v43_v24, %v43_v24  ;;  %v832_v31 = vld [vmem:[%s1204_s0 + $0xac] ss:$8 sps:$4 sm:$0xff]  }
   0x9   :  { %v822_v23 = vld [vmem:[%s1204_s0 + $0x58] ss:$8 sps:$4 sm:$0xff]   ;;  %v727_v25 = vld [vmem:[%s1204_s0 + $0x68] sm:$0x11]  ;;  %v829_v30 = vld [vmem:[%s1204_s0 + $0x74] ss:$8 sps:$4 sm:$0xff]  }
   0xa   :  { %156 = vmatpush1.bf16.msra.mxu0 %v896_v3  ;;  %273 = vmatpush1.bf16.msra.mxu1 %v896_v3  ;;  %v735_v27 = vcombine.high %v727_v25, %v727_v25  ;;  %v734_v29 = vcombine.low %v727_v25, %v727_v25  ;;  %v827_v32 = vld [vmem:[%s1204_s0 + $0x70] ss:$8 sps:$4 sm:$0xff]   ;;  %v833_v34 = vld [vmem:[%s1204_s0 + $0x84] ss:$8 sps:$4 sm:$0xff]   ;;  %v837_v36 = vld [vmem:[%s1204_s0 + $0x80] ss:$8 sps:$4 sm:$0xff]  }
   0xb   :  { %157 = vmatprep.subr.bf16.mxu0 %v849_v0  ;;  %274 = vmatprep.subr.bf16.mxu1 %v849_v0  ;;  %v830_v33 = vld [vmem:[%s1204_s0 + $0xa8] ss:$8 sps:$4 sm:$0xff]   ;;  %v835_v35 = vld [vmem:[%s1204_s0 + $0xbc] ss:$8 sps:$4 sm:$0xff]   ;;  %v838_v37 = vld [vmem:[%s1204_s0 + $0xb8] ss:$8 sps:$4 sm:$0xff]  }
   0xc   :  { %v839_v38 = vld [vmem:[%s1204_s0 + $0x94] ss:$8 sps:$4 sm:$0xff]   ;;  %v746_v40 = vld [vmem:[%s1204_s0 + $0xa0] sm:$0x11]  ;;  %v843_v42 = vld [vmem:[%s1204_s0 + $0x90] ss:$8 sps:$4 sm:$0xff]  }
   0xd   :  { %v841_v39 = vld [vmem:[%s1204_s0 + $0xcc] ss:$8 sps:$4 sm:$0xff]   ;;  %v765_v41 = vld [vmem:[%s1204_s0 + $0xd8] sm:$0x11]  ;;  %v844_v43 = vld [vmem:[%s1204_s0 + $0xc8] ss:$8 sps:$4 sm:$0xff]   ;;  %v754_v44 = vcombine.high %v746_v40, %v746_v40  ;;  %v753_v46 = vcombine.low %v746_v40, %v746_v40 }
   0xe   :  { %158 = vmatpush1.bf16.msra.mxu0 %v905_v4  ;;  %275 = vmatpush1.bf16.msra.mxu1 %v905_v4  ;;  %v773_v45 = vcombine.high %v765_v41, %v765_v41  ;;  %v772_v47 = vcombine.low %v765_v41, %v765_v41 }
   0xf   :  { %159 = vmatprep.subr.bf16.mxu0 %v849_v0  ;;  %276 = vmatprep.subr.bf16.mxu1 %v849_v0 }
  0x12   :  { %160 = vmatpush1.bf16.msra.mxu0 %v921_v7  ;;  %277 = vmatpush1.bf16.msra.mxu1 %v921_v7 }
  0x13   :  { %161 = vmatprep.subr.bf16.mxu0 %v849_v0  ;;  %278 = vmatprep.subr.bf16.mxu1 %v849_v0 }
  0x16   :  { %162 = vmatpush1.bf16.msra.mxu0 %v931_v8  ;;  %279 = vmatpush1.bf16.msra.mxu1 %v931_v8 }
  0x17   :  { %163 = vmatprep.subr.bf16.mxu0 %v849_v0  ;;  %280 = vmatprep.subr.bf16.mxu1 %v849_v0 }
  0x1a   :  { %164 = vmatpush1.bf16.msra.mxu0 %v940_v9  ;;  %281 = vmatpush1.bf16.msra.mxu1 %v940_v9 }
  0x1b   :  { %165 = vmatprep.subr.bf16.mxu0 %v849_v0  ;;  %282 = vmatprep.subr.bf16.mxu1 %v849_v0 }
  0x1e   :  { %166 = vmatpush1.bf16.msra.mxu0 %v949_v10  ;;  %283 = vmatpush1.bf16.msra.mxu1 %v949_v10 }
  0x1f   :  { %179 = vmatprep.subr.bf16.mxu0 %v849_v0  ;;  %296 = vmatprep.subr.bf16.mxu1 %v849_v0 }
  0x22   :  { %180 = vmatpush2.bf16.msra.mxu0 %v960_v12  ;;  %297 = vmatpush2.bf16.msra.mxu1 %v960_v12 }
  0x23   :  { %181 = vmatprep.subr.bf16.mxu0 %v849_v0  ;;  %298 = vmatprep.subr.bf16.mxu1 %v849_v0 }
  0x26   :  { %182 = vmatpush2.bf16.msra.mxu0 %v967_v13  ;;  %299 = vmatpush2.bf16.msra.mxu1 %v967_v13 }
  0x27   :  { %385 = vmatprep.subr.bf16.mxu0 %v849_v0  ;;  %502 = vmatprep.subr.bf16.mxu1 %v849_v0 }
  0x29   :  { %184 = vmatmul.mubr.bf16.vlgmr.msra.gmra.mxu0 %v805_v14  ;;  %301 = vmatmul.mubr.bf16.vlgmr.msra.gmra.mxu1 %v808_v15 }
  0x2a   :  { %386 = vmatpush1.bf16.msra.mxu0 %v880_v1  ;;  %503 = vmatpush1.bf16.msra.mxu1 %v880_v1 }
  0x2b   :  { %387 = vmatprep.subr.bf16.mxu0 %v849_v0  ;;  %504 = vmatprep.subr.bf16.mxu1 %v849_v0 }
  0x2c   :  { %718 = vmatprep.mubr.msk.bf16.mxu0 %vm134_vm0, %v811_v16  ;;  %737 = vmatprep.mubr.msk.bf16.mxu1 %vm134_vm0, %v813_v17 }
  0x2e   :  { %388 = vmatpush1.bf16.msra.mxu0 %v887_v2  ;;  %505 = vmatpush1.bf16.msra.mxu1 %v887_v2 }
  0x2f   :  { %389 = vmatprep.subr.bf16.mxu0 %v849_v0  ;;  %506 = vmatprep.subr.bf16.mxu1 %v849_v0 }
  0x31   :  { %192 = vmatmul.mubr.bf16.gmra.mxu0 %v815_v18  ;;  %309 = vmatmul.mubr.bf16.gmra.mxu1 %v816_v19 }
  0x32   :  { %390 = vmatpush1.bf16.msra.mxu0 %v896_v3  ;;  %507 = vmatpush1.bf16.msra.mxu1 %v896_v3 }
  0x33   :  { %391 = vmatprep.subr.bf16.mxu0 %v849_v0  ;;  %508 = vmatprep.subr.bf16.mxu1 %v849_v0 }
  0x34   :  { %719 = vmatprep.mubr.msk.bf16.mxu0 %vm134_vm0, %v817_v20  ;;  %738 = vmatprep.mubr.msk.bf16.mxu1 %vm134_vm0, %v819_v21 }
  0x36   :  { %392 = vmatpush1.bf16.msra.mxu0 %v905_v4  ;;  %509 = vmatpush1.bf16.msra.mxu1 %v905_v4 }
  0x37   :  { %393 = vmatprep.subr.bf16.mxu0 %v849_v0  ;;  %510 = vmatprep.subr.bf16.mxu1 %v849_v0 }
  0x39   :  { %200 = vmatmul.mubr.bf16.gmra.mxu0 %v821_v22  ;;  %317 = vmatmul.mubr.bf16.gmra.mxu1 %v822_v23  ;;  %v1128_v22 = vld [vmem:[%s1205_s2] ss:$0 sm:$0xff] }
  0x3a   :  { %394 = vmatpush1.bf16.msra.mxu0 %v921_v7  ;;  %511 = vmatpush1.bf16.msra.mxu1 %v921_v7 }
  0x3b   :  { %395 = vmatprep.subr.bf16.mxu0 %v849_v0  ;;  %512 = vmatprep.subr.bf16.mxu1 %v849_v0 }
  0x3c   :  { %720 = vmatprep.mubr.msk.bf16.mxu0 %vm134_vm0, %v706_v26  ;;  %739 = vmatprep.mubr.msk.bf16.mxu1 %vm134_vm0, %v735_v27 }
  0x3e   :  { %396 = vmatpush1.bf16.msra.mxu0 %v931_v8  ;;  %513 = vmatpush1.bf16.msra.mxu1 %v931_v8 }
  0x3f   :  { %397 = vmatprep.subr.bf16.mxu0 %v849_v0  ;;  %514 = vmatprep.subr.bf16.mxu1 %v849_v0 }
  0x41   :  { %208 = vmatmul.mubr.bf16.gmra.mxu0 %v705_v28  ;;  %325 = vmatmul.mubr.bf16.gmra.mxu1 %v734_v29 }
  0x42   :  { %398 = vmatpush1.bf16.msra.mxu0 %v940_v9  ;;  %515 = vmatpush1.bf16.msra.mxu1 %v940_v9 }
  0x43   :  { %399 = vmatprep.subr.bf16.mxu0 %v849_v0  ;;  %516 = vmatprep.subr.bf16.mxu1 %v849_v0 }
  0x44   :  { %755 = vmatprep.mubr.msk.bf16.mxu0 %vm134_vm0, %v829_v30  ;;  %774 = vmatprep.mubr.msk.bf16.mxu1 %vm134_vm0, %v832_v31 }
  0x46   :  { %400 = vmatpush1.bf16.msra.mxu0 %v949_v10  ;;  %517 = vmatpush1.bf16.msra.mxu1 %v949_v10 }
  0x47   :  { %413 = vmatprep.subr.bf16.mxu0 %v849_v0  ;;  %530 = vmatprep.subr.bf16.mxu1 %v849_v0 }
  0x4a   :  { %414 = vmatpush2.bf16.msra.mxu0 %v960_v12  ;;  %531 = vmatpush2.bf16.msra.mxu1 %v960_v12 }
  0x4b   :  { %415 = vmatprep.subr.bf16.mxu0 %v849_v0  ;;  %532 = vmatprep.subr.bf16.mxu1 %v849_v0 }
  0x4e   :  { %416 = vmatpush2.bf16.msra.mxu0 %v967_v13  ;;  %533 = vmatpush2.bf16.msra.mxu1 %v967_v13 }
  0x51   :  { %418 = vmatmul.mubr.bf16.vlgmr.msra.gmra.mxu0 %v827_v32  ;;  %535 = vmatmul.mubr.bf16.vlgmr.msra.gmra.mxu1 %v830_v33 }
  0x52   :  { %756 = vmatprep.mubr.msk.bf16.mxu0 %vm134_vm0, %v833_v34  ;;  %775 = vmatprep.mubr.msk.bf16.mxu1 %vm134_vm0, %v835_v35  ;;  %v1135_v35 = vld [vmem:[%s1206_s3] ss:$0 sm:$0xff] }
  0x59   :  { %426 = vmatmul.mubr.bf16.gmra.mxu0 %v837_v36  ;;  %543 = vmatmul.mubr.bf16.gmra.mxu1 %v838_v37 }
  0x5a   :  { %757 = vmatprep.mubr.msk.bf16.mxu0 %vm134_vm0, %v839_v38  ;;  %776 = vmatprep.mubr.msk.bf16.mxu1 %vm134_vm0, %v841_v39 }
  0x61   :  { %434 = vmatmul.mubr.bf16.gmra.mxu0 %v843_v42  ;;  %551 = vmatmul.mubr.bf16.gmra.mxu1 %v844_v43 }
  0x62   :  { %758 = vmatprep.mubr.msk.bf16.mxu0 %vm134_vm0, %v754_v44  ;;  %777 = vmatprep.mubr.msk.bf16.mxu1 %vm134_vm0, %v773_v45 }
  0x69   :  { %442 = vmatmul.mubr.bf16.gmra.mxu0 %v753_v46  ;;  %559 = vmatmul.mubr.bf16.gmra.mxu1 %v772_v47 }
  0xe9   :  { %v185_v48 = vpop.f32.mrf.mxu0  ;;  %v302_v49 = vpop.f32.mrf.mxu1 }
  0xea   :  { %v566_v18 = vmax.f32 %v185_v48, %v302_v49  ;;  %v587_v19 = vmin.f32 %v185_v48, %v302_v49 }
  0xeb   :  { %v187_v50 = vpop.f32.mrf.mxu0  ;;  %v304_v51 = vpop.f32.mrf.mxu1 }
  0xed   :  { %v188_v52 = vpop.f32.mrf.mxu0  ;;  %v305_v53 = vpop.f32.mrf.mxu1 }
  0xee   :  { %v567_v27 = vmax.f32 %v188_v52, %v305_v53  ;;  %v588_v28 = vmin.f32 %v188_v52, %v305_v53 }
  0xef   :  { %v190_v54 = vpop.f32.mrf.mxu0  ;;  %v307_v55 = vpop.f32.mrf.mxu1 }
  0xf1   :  { %v1105_v56 = vpop.f32.mrf.mxu0  ;;  %v1107_v57 = vpop.f32.mrf.mxu1 }
  0xf2   :  { %v568_v41 = vmax.f32 %v1105_v56, %v1107_v57  ;;  %v589_v48 = vmin.f32 %v1105_v56, %v1107_v57 }
  0xf3   :  { %v195_v58 = vpop.f32.mrf.mxu0  ;;  %v312_v59 = vpop.f32.mrf.mxu1 }
  0xf5   :  { %v1109_v60 = vpop.f32.mrf.mxu0  ;;  %v1111_v61 = vpop.f32.mrf.mxu1 }
  0xf6   :  { %v569_v55 = vmax.f32 %v1109_v60, %v1111_v61  ;;  %v590_v56 = vmin.f32 %v1109_v60, %v1111_v61 }
  0xf7   :  { %v198_v62 = vpop.f32.mrf.mxu0  ;;  %v315_v63 = vpop.f32.mrf.mxu1 }
  0xf9   :  { %v1113_v0 = vpop.f32.mrf.mxu0  ;;  %v1115_v1 = vpop.f32.mrf.mxu1 }
  0xfb   :  { %v203_v2 = vpop.f32.mrf.mxu0  ;;  %v320_v3 = vpop.f32.mrf.mxu1 }
  0xfd   :  { %v1117_v4 = vpop.f32.mrf.mxu0  ;;  %v1119_v5 = vpop.f32.mrf.mxu1 }
  0xff   :  { %v206_v6 = vpop.f32.mrf.mxu0  ;;  %v323_v7 = vpop.f32.mrf.mxu1 }
 0x101   :  { %v1121_v8 = vpop.f32.mrf.mxu0  ;;  %v1123_v9 = vpop.f32.mrf.mxu1 }
 0x103   :  { %v211_v10 = vpop.f32.mrf.mxu0  ;;  %v328_v11 = vpop.f32.mrf.mxu1 }
 0x105   :  { %v212_v12 = vpop.f32.mrf.mxu0  ;;  %v329_v13 = vpop.f32.mrf.mxu1 }
 0x107   :  { %v213_v14 = vpop.f32.mrf.mxu0  ;;  %v330_v15 = vpop.f32.mrf.mxu1 }
 0x108   :  { %v570_v14 = vmax.f32 %v1113_v0, %v1115_v1  ;;  %v591_v15 = vmin.f32 %v1113_v0, %v1115_v1 }
 0x111   :  { %v419_v16 = vpop.f32.mrf.mxu0  ;;  %v536_v17 = vpop.f32.mrf.mxu1 }
 0x112   :  { %v573_v20 = vmax.f32 %v419_v16, %v536_v17  ;;  %v594_v21 = vmin.f32 %v419_v16, %v536_v17 }
 0x113   :  { %v421_v23 = vpop.f32.mrf.mxu0  ;;  %v538_v24 = vpop.f32.mrf.mxu1 }
 0x114   :  { %v580_v25 = vmax.f32 %v566_v18, %v573_v20  ;;  %v601_v26 = vmin.f32 %v587_v19, %v594_v21 }
 0x115   :  { %v422_v29 = vpop.f32.mrf.mxu0  ;;  %v539_v30 = vpop.f32.mrf.mxu1 }
 0x116   :  { %v616_v31 = vmul.f32 %v1128_v22, %v580_v25  ;;  %v623_v32 = vmul.f32 %v1128_v22, %v601_v26  ;;  %v574_v33 = vmax.f32 %v422_v29, %v539_v30  ;;  %v595_v34 = vmin.f32 %v422_v29, %v539_v30 }
 0x117   :  { %v424_v36 = vpop.f32.mrf.mxu0  ;;  %v541_v37 = vpop.f32.mrf.mxu1 }
 0x118   :  { %v630_v38 = vmax.f32 %v616_v31, %v623_v32  ;;  %v581_v39 = vmax.f32 %v567_v27, %v574_v33  ;;  %v602_v40 = vmin.f32 %v588_v28, %v595_v34  ;;  %v571_v27 = vmax.f32 %v1117_v4, %v1119_v5 }
 0x119   :  { %v427_v42 = vpop.f32.mrf.mxu0  ;;  %v544_v43 = vpop.f32.mrf.mxu1  ;;  %v592_v28 = vmin.f32 %v1117_v4, %v1119_v5  ;;  %v572_v4 = vmax.f32 %v1121_v8, %v1123_v9 }
 0x11a   :  { %v643_v44 = vadd.f32 %v1135_v35, %v630_v38  ;;  %v617_v45 = vmul.f32 %v1128_v22, %v581_v39  ;;  %v624_v46 = vmul.f32 %v1128_v22, %v602_v40  ;;  %v575_v47 = vmax.f32 %v427_v42, %v544_v43 }
 0x11b   :  { %v596_v49 = vmin.f32 %v427_v42, %v544_v43  ;;  %v429_v50 = vpop.f32.mrf.mxu0  ;;  %v546_v51 = vpop.f32.mrf.mxu1 }
 0x11c   :  { %v650_v52 = vmax.f32 %v643_v44, 0.0  ;;  %v631_v53 = vmax.f32 %v617_v45, %v624_v46  ;;  %v582_v54 = vmax.f32 %v568_v41, %v575_v47  ;;  %v593_v51 = vmin.f32 %v1121_v8, %v1123_v9 }
 0x11d   :  { %v603_v58 = vmin.f32 %v589_v48, %v596_v49  ;;  %v430_v59 = vpop.f32.mrf.mxu0  ;;  %v547_v62 = vpop.f32.mrf.mxu1 }
 0x11e   :  { %v787_v63 = vpack.c.bf16 %v650_v52, %v650_v52  ;;  %v644_v2 = vadd.f32 %v1135_v35, %v631_v53  ;;  %v618_v3 = vmul.f32 %v1128_v22, %v582_v54  ;;  %v576_v6 = vmax.f32 %v430_v59, %v547_v62 }
 0x11f   :  { %v625_v57 = vmul.f32 %v1128_v22, %v603_v58  ;;  %v597_v7 = vmin.f32 %v430_v59, %v547_v62  ;;  %v432_v10 = vpop.f32.mrf.mxu0  ;;  %v549_v11 = vpop.f32.mrf.mxu1 }
 0x120   :  { %687 = vst.msk [vmem:[%s1207_s4] sm:$0xf] %vm686_vm2, %v787_v63  ;;  %v651_v12 = vmax.f32 %v644_v2, 0.0  ;;  %v583_v13 = vmax.f32 %v569_v55, %v576_v6 }
 0x121   :  { %v632_v16 = vmax.f32 %v618_v3, %v625_v57  ;;  %v604_v60 = vmin.f32 %v590_v56, %v597_v7  ;;  %v435_v61 = vpop.f32.mrf.mxu0  ;;  %v552_v17 = vpop.f32.mrf.mxu1 }
 0x122   :  { %v788_v18 = vpack.c.bf16 %v651_v12, %v651_v12  ;;  %v619_v19 = vmul.f32 %v1128_v22, %v583_v13  ;;  %v577_v20 = vmax.f32 %v435_v61, %v552_v17  ;;  %v598_v21 = vmin.f32 %v435_v61, %v552_v17 }
 0x123   :  { %v645_v23 = vadd.f32 %v1135_v35, %v632_v16  ;;  %v626_v24 = vmul.f32 %v1128_v22, %v604_v60  ;;  %v437_v25 = vpop.f32.mrf.mxu0  ;;  %v554_v26 = vpop.f32.mrf.mxu1 }
 0x124   :  { %688 = vst.msk [vmem:[%s1207_s4 + $0x4] sm:$0xf] %vm686_vm2, %v788_v18  ;;  %v584_v0 = vmax.f32 %v570_v14, %v577_v20  ;;  %v605_v1 = vmin.f32 %v591_v15, %v598_v21 }
 0x125   :  { %v652_v29 = vmax.f32 %v645_v23, 0.0  ;;  %v633_v30 = vmax.f32 %v619_v19, %v626_v24  ;;  %v438_v31 = vpop.f32.mrf.mxu0  ;;  %v555_v32 = vpop.f32.mrf.mxu1 }
 0x126   :  { %v620_v33 = vmul.f32 %v1128_v22, %v584_v0  ;;  %v627_v34 = vmul.f32 %v1128_v22, %v605_v1  ;;  %v578_v36 = vmax.f32 %v438_v31, %v555_v32  ;;  %v599_v37 = vmin.f32 %v438_v31, %v555_v32 }
 0x127   :  { %v789_v38 = vpack.c.bf16 %v652_v29, %v652_v29  ;;  %v646_v39 = vadd.f32 %v1135_v35, %v633_v30  ;;  %v440_v40 = vpop.f32.mrf.mxu0  ;;  %v557_v41 = vpop.f32.mrf.mxu1 }
 0x128   :  { %v634_v42 = vmax.f32 %v620_v33, %v627_v34  ;;  %v585_v43 = vmax.f32 %v571_v27, %v578_v36  ;;  %v606_v44 = vmin.f32 %v592_v28, %v599_v37 }
 0x129   :  { %689 = vst.msk [vmem:[%s1207_s4 + $0x8] sm:$0xf] %vm686_vm2, %v789_v38  ;;  %v653_v5 = vmax.f32 %v646_v39, 0.0  ;;  %v443_v45 = vpop.f32.mrf.mxu0  ;;  %v560_v46 = vpop.f32.mrf.mxu1 }
 0x12a   :  { %v647_v47 = vadd.f32 %v1135_v35, %v634_v42  ;;  %v621_v48 = vmul.f32 %v1128_v22, %v585_v43  ;;  %v628_v49 = vmul.f32 %v1128_v22, %v606_v44  ;;  %v579_v50 = vmax.f32 %v443_v45, %v560_v46 }
 0x12b   :  { %v790_v52 = vpack.c.bf16 %v653_v5, %v653_v5  ;;  %v600_v53 = vmin.f32 %v443_v45, %v560_v46  ;;  %v445_v54 = vpop.f32.mrf.mxu0  ;;  %v562_v55 = vpop.f32.mrf.mxu1 }
 0x12c   :  { %v654_v58 = vmax.f32 %v647_v47, 0.0  ;;  %v635_v59 = vmax.f32 %v621_v48, %v628_v49  ;;  %v586_v62 = vmax.f32 %v572_v4, %v579_v50 }
 0x12d   :  { %690 = vst.msk [vmem:[%s1207_s4 + $0xc] sm:$0xf] %vm686_vm2, %v790_v52  ;;  %v607_v63 = vmin.f32 %v593_v51, %v600_v53  ;;  %v446_v2 = vpop.f32.mrf.mxu0  ;;  %v563_v3 = vpop.f32.mrf.mxu1 }
 0x12e   :  { %v791_v6 = vpack.c.bf16 %v654_v58, %v654_v58  ;;  %v648_v56 = vadd.f32 %v1135_v35, %v635_v59  ;;  %v622_v8 = vmul.f32 %v1128_v22, %v586_v62 }
 0x12f   :  { %v629_v9 = vmul.f32 %v1128_v22, %v607_v63  ;;  %v447_v57 = vpop.f32.mrf.mxu0  ;;  %v564_v7 = vpop.f32.mrf.mxu1 }
 0x130   :  { %691 = vst.msk [vmem:[%s1207_s4 + $0x10] sm:$0xf] %vm686_vm2, %v791_v6  ;;  %v655_v10 = vmax.f32 %v648_v56, 0.0 }
 0x131   :  { %v636_v11 = vmax.f32 %v622_v8, %v629_v9 }
 0x132   :  { %v792_v12 = vpack.c.bf16 %v655_v10, %v655_v10 }
 0x133   :  { %v649_v13 = vadd.f32 %v1135_v35, %v636_v11 }
 0x134   :  { %692 = vst.msk [vmem:[%s1207_s4 + $0x14] sm:$0xf] %vm686_vm2, %v792_v12 }
 0x135   :  { %v656_v14 = vmax.f32 %v649_v13, 0.0 }
 0x137   :  { %v793_v22 = vpack.c.bf16 %v656_v14, %v656_v14 }
 0x139   :  { %694 = vst.msk [vmem:[%s1207_s4 + $0x18] sm:$0x1] %vm693_vm3, %v793_v22 }

// kernel: lenet5_forward.5
= control target key start
LH: loop header
LB: loop body
LE: loop exit
PB: predicated region body
PF: predicated region fallthrough
CT: control target
= control target key end

     0   :  { %v826_v39 = vmov 0.0   ;;  %vm827_vm0 = vmmov 0   ;;  %s1030_s1 = inlined_call_operand.vmem [shape: bf16[512,128], index: 1, kind: input, shape index: {}]   ;;  %s1031_s0 = inlined_call_operand.vmem [shape: bf16[8,512], index: 0, kind: input, shape index: {}]   ;;  %s1032_s3 = inlined_call_operand.vmem [shape: bf16[128,128], index: 3, kind: input, shape index: {}]   ;;  %s1033_s5 = inlined_call_operand.vmem [shape: bf16[128,128], index: 5, kind: input, shape index: {}]   ;;  %s1034_s2 = inlined_call_operand.vmem [shape: f32[1,128], index: 2, kind: input, shape index: {}]   ;;  %s1035_s4 = inlined_call_operand.vmem [shape: f32[1,128], index: 4, kind: input, shape index: {}]   ;;  %s1036_s6 = inlined_call_operand.vmem [shape: f32[1,128], index: 6, kind: input, shape index: {}]   ;;  %s1037_s7 = inlined_call_operand.vmem [shape: f32[8,128], index: 7, kind: output, shape index: {}]  }
   0x1   :  { %v774_v0 = vld [vmem:[%s1030_s1 + $0x78] sm:$0xff]   ;;  %v778_v4 = vld [vmem:[%s1030_s1 + $0x70] sm:$0xff]   ;;  %v782_v8 = vld [vmem:[%s1030_s1 + $0x68] sm:$0xff]  }
   0x2   :  { %v775_v1 = vld [vmem:[%s1030_s1 + $0xf8] sm:$0xff]   ;;  %670 = vmatprep.subr.bf16.mxu0 %v774_v0  ;;  %v779_v5 = vld [vmem:[%s1030_s1 + $0xf0] sm:$0xff]   ;;  %v783_v9 = vld [vmem:[%s1030_s1 + $0xe8] sm:$0xff]  }
   0x3   :  { %v776_v2 = vld [vmem:[%s1030_s1 + $0x38] sm:$0xff]   ;;  %692 = vmatprep.subr.bf16.mxu1 %v775_v1  ;;  %v780_v6 = vld [vmem:[%s1030_s1 + $0x30] sm:$0xff]   ;;  %v784_v10 = vld [vmem:[%s1030_s1 + $0x28] sm:$0xff]  }
   0x4   :  { %v777_v3 = vld [vmem:[%s1030_s1 + $0xb8] sm:$0xff]   ;;  %671 = vmatpush3.bf16.msra.mxu0 %v776_v2  ;;  %v781_v7 = vld [vmem:[%s1030_s1 + $0xb0] sm:$0xff]   ;;  %v785_v11 = vld [vmem:[%s1030_s1 + $0xa8] sm:$0xff]  }
   0x5   :  { %693 = vmatpush3.bf16.msra.mxu1 %v777_v3  ;;  %672 = vmatprep.subr.bf16.mxu0 %v778_v4  ;;  %v786_v12 = vld [vmem:[%s1030_s1 + $0x60] sm:$0xff]   ;;  %v790_v16 = vld [vmem:[%s1030_s1 + $0x58] sm:$0xff]   ;;  %v794_v20 = vld [vmem:[%s1030_s1 + $0x50] sm:$0xff]  }
   0x6   :  { %694 = vmatprep.subr.bf16.mxu1 %v779_v5  ;;  %v787_v13 = vld [vmem:[%s1030_s1 + $0xe0] sm:$0xff]   ;;  %v791_v17 = vld [vmem:[%s1030_s1 + $0xd8] sm:$0xff]   ;;  %v795_v21 = vld [vmem:[%s1030_s1 + $0xd0] sm:$0xff]  }
   0x7   :  { %v788_v14 = vld [vmem:[%s1030_s1 + $0x20] sm:$0xff]   ;;  %v792_v18 = vld [vmem:[%s1030_s1 + $0x18] sm:$0xff]   ;;  %v796_v22 = vld [vmem:[%s1030_s1 + $0x10] sm:$0xff]  }
   0x8   :  { %673 = vmatpush3.bf16.msra.mxu0 %v780_v6  ;;  %v789_v15 = vld [vmem:[%s1030_s1 + $0xa0] sm:$0xff]   ;;  %v793_v19 = vld [vmem:[%s1030_s1 + $0x98] sm:$0xff]   ;;  %v797_v23 = vld [vmem:[%s1030_s1 + $0x90] sm:$0xff]  }
   0x9   :  { %695 = vmatpush3.bf16.msra.mxu1 %v781_v7  ;;  %674 = vmatprep.subr.bf16.mxu0 %v782_v8  ;;  %v798_v24 = vld [vmem:[%s1030_s1 + $0x48] sm:$0xff]   ;;  %v802_v28 = vld [vmem:[%s1030_s1 + $0x40] sm:$0xff]   ;;  %v810_v38 = vld [vmem:[%s1032_s3 + $0x38] sm:$0xff]  }
   0xa   :  { %696 = vmatprep.subr.bf16.mxu1 %v783_v9  ;;  %v799_v25 = vld [vmem:[%s1030_s1 + $0xc8] sm:$0xff]   ;;  %v803_v29 = vld [vmem:[%s1030_s1 + $0xc0] sm:$0xff]   ;;  %v811_v40 = vld [vmem:[%s1032_s3 + $0x30] sm:$0xff]  }
   0xb   :  { %v800_v26 = vld [vmem:[%s1030_s1 + $0x8] sm:$0xff]   ;;  %v804_v30 = vld [vmem:[%s1030_s1] sm:$0xff]   ;;  %v814_v43 = vld [vmem:[%s1032_s3 + $0x18] sm:$0xff]  }
   0xc   :  { %675 = vmatpush3.bf16.msra.mxu0 %v784_v10  ;;  %v801_v27 = vld [vmem:[%s1030_s1 + $0x88] sm:$0xff]   ;;  %v805_v31 = vld [vmem:[%s1030_s1 + $0x80] sm:$0xff]   ;;  %v815_v44 = vld [vmem:[%s1032_s3 + $0x10] sm:$0xff]  }
   0xd   :  { %697 = vmatpush3.bf16.msra.mxu1 %v785_v11  ;;  %676 = vmatprep.subr.bf16.mxu0 %v786_v12  ;;  %v27_v32 = vld [vmem:[%s1031_s0] sm:$0xff]  ;;  %v28_v33 = vld [vmem:[%s1031_s0 + $0x8] sm:$0xff]  ;;  %v818_v47 = vld [vmem:[%s1033_s5 + $0x38] sm:$0xff]  }
   0xe   :  { %698 = vmatprep.subr.bf16.mxu1 %v787_v13  ;;  %v616_v34 = vcombine.low %v27_v32, %v27_v32  ;;  %v617_v35 = vcombine.high %v27_v32, %v27_v32  ;;  %v618_v36 = vcombine.low %v28_v33, %v28_v33  ;;  %v619_v37 = vcombine.high %v28_v33, %v28_v33  ;;  %v812_v41 = vld [vmem:[%s1032_s3 + $0x28] sm:$0xff]   ;;  %v813_v42 = vld [vmem:[%s1032_s3 + $0x20] sm:$0xff]   ;;  %v819_v48 = vld [vmem:[%s1033_s5 + $0x30] sm:$0xff]  }
   0xf   :  { %v816_v45 = vld [vmem:[%s1032_s3 + $0x8] sm:$0xff]   ;;  %v817_v46 = vld [vmem:[%s1032_s3] sm:$0xff]   ;;  %v822_v51 = vld [vmem:[%s1033_s5 + $0x18] sm:$0xff]  }
  0x10   :  { %677 = vmatpush3.bf16.msra.mxu0 %v788_v14  ;;  %338 = vmatprep.mubr.bf16.mxu0 %v617_v35  ;;  %v820_v49 = vld [vmem:[%s1033_s5 + $0x28] sm:$0xff]   ;;  %v821_v50 = vld [vmem:[%s1033_s5 + $0x20] sm:$0xff]   ;;  %v823_v52 = vld [vmem:[%s1033_s5 + $0x10] sm:$0xff]  }
  0x11   :  { %699 = vmatpush3.bf16.msra.mxu1 %v789_v15  ;;  %678 = vmatprep.subr.bf16.mxu0 %v790_v16  ;;  %v824_v53 = vld [vmem:[%s1033_s5 + $0x8] sm:$0xff]   ;;  %v615_v56 = vld [vmem:[%s1034_s2] ss:$0 sm:$0xff] }
  0x12   :  { %700 = vmatprep.subr.bf16.mxu1 %v791_v17  ;;  %378 = vmatprep.mubr.bf16.mxu1 %v619_v37  ;;  %v825_v4 = vld [vmem:[%s1033_s5] sm:$0xff]  }
  0x13   :  { %v652_v5 = vld [vmem:[%s1035_s4] ss:$0 sm:$0xff] }
  0x14   :  { %679 = vmatpush3.bf16.msra.mxu0 %v792_v18  ;;  %v661_v12 = vld [vmem:[%s1036_s6] ss:$0 sm:$0xff] }
  0x15   :  { %701 = vmatpush3.bf16.msra.mxu1 %v793_v19  ;;  %680 = vmatprep.subr.bf16.mxu0 %v794_v20 }
  0x16   :  { %702 = vmatprep.subr.bf16.mxu1 %v795_v21 }
  0x18   :  { %681 = vmatpush3.bf16.msra.mxu0 %v796_v22 }
  0x19   :  { %703 = vmatpush3.bf16.msra.mxu1 %v797_v23  ;;  %682 = vmatprep.subr.bf16.mxu0 %v798_v24 }
  0x1a   :  { %704 = vmatprep.subr.bf16.mxu1 %v799_v25 }
  0x1c   :  { %683 = vmatpush3.bf16.msra.mxu0 %v800_v26 }
  0x1d   :  { %705 = vmatpush3.bf16.msra.mxu1 %v801_v27  ;;  %684 = vmatprep.subr.bf16.mxu0 %v802_v28 }
  0x1e   :  { %706 = vmatprep.subr.bf16.mxu1 %v803_v29 }
  0x20   :  { %685 = vmatpush3.bf16.msra.mxu0 %v804_v30 }
  0x21   :  { %707 = vmatpush3.bf16.msra.mxu1 %v805_v31  ;;  %732 = vmatprep.subr.bf16.mxu0 %v826_v39 }
  0x22   :  { %752 = vmatprep.subr.bf16.mxu1 %v826_v39 }
  0x23   :  { %339 = vmatmul.mubr.bf16.vlgmr.msra.gmra.mxu0 %v616_v34 }
  0x24   :  { %379 = vmatmul.mubr.bf16.vlgmr.msra.gmra.mxu1 %v618_v36  ;;  %733 = vmatpush3.bf16.msra.mxu0 %v810_v38 }
  0x25   :  { %734 = vmatprep.subr.bf16.mxu0 %v826_v39  ;;  %748 = vmatprep.mubr.msk.bf16.mxu0 %vm827_vm0, %v826_v39 }
  0x26   :  { %768 = vmatprep.mubr.msk.bf16.mxu1 %vm827_vm0, %v826_v39  ;;  %753 = vmatpush3.bf16.msra.mxu1 %v818_v47 }
  0x27   :  { %754 = vmatprep.subr.bf16.mxu1 %v826_v39 }
  0x28   :  { %735 = vmatpush3.bf16.msra.mxu0 %v811_v40 }
  0x29   :  { %736 = vmatprep.subr.bf16.mxu0 %v826_v39 }
  0x2a   :  { %755 = vmatpush3.bf16.msra.mxu1 %v819_v48 }
  0x2b   :  { %756 = vmatprep.subr.bf16.mxu1 %v826_v39 }
  0x2c   :  { %737 = vmatpush3.bf16.msra.mxu0 %v812_v41 }
  0x2d   :  { %738 = vmatprep.subr.bf16.mxu0 %v826_v39 }
  0x2e   :  { %757 = vmatpush3.bf16.msra.mxu1 %v820_v49 }
  0x2f   :  { %758 = vmatprep.subr.bf16.mxu1 %v826_v39 }
  0x30   :  { %739 = vmatpush3.bf16.msra.mxu0 %v813_v42 }
  0x31   :  { %740 = vmatprep.subr.bf16.mxu0 %v826_v39 }
  0x32   :  { %759 = vmatpush3.bf16.msra.mxu1 %v821_v50 }
  0x33   :  { %760 = vmatprep.subr.bf16.mxu1 %v826_v39 }
  0x34   :  { %741 = vmatpush3.bf16.msra.mxu0 %v814_v43 }
  0x35   :  { %742 = vmatprep.subr.bf16.mxu0 %v826_v39 }
  0x36   :  { %761 = vmatpush3.bf16.msra.mxu1 %v822_v51 }
  0x37   :  { %762 = vmatprep.subr.bf16.mxu1 %v826_v39 }
  0x38   :  { %743 = vmatpush3.bf16.msra.mxu0 %v815_v44 }
  0x39   :  { %744 = vmatprep.subr.bf16.mxu0 %v826_v39 }
  0x3a   :  { %763 = vmatpush3.bf16.msra.mxu1 %v823_v52 }
  0x3b   :  { %764 = vmatprep.subr.bf16.mxu1 %v826_v39 }
  0x3c   :  { %745 = vmatpush3.bf16.msra.mxu0 %v816_v45 }
  0x3d   :  { %746 = vmatprep.subr.bf16.mxu0 %v826_v39 }
  0x3e   :  { %765 = vmatpush3.bf16.msra.mxu1 %v824_v53 }
  0x3f   :  { %766 = vmatprep.subr.bf16.mxu1 %v826_v39 }
  0x40   :  { %747 = vmatpush3.bf16.msra.mxu0 %v817_v46 }
  0x42   :  { %767 = vmatpush3.bf16.msra.mxu1 %v825_v4 }
  0xe3   :  { %v686_v54 = vpop.f32.mrf.mxu0 }
  0xe4   :  { %v708_v55 = vpop.f32.mrf.mxu1 }
  0xe5   :  { %v687_v57 = vpop.f32.mrf.mxu0 }
  0xe6   :  { %v709_v58 = vpop.f32.mrf.mxu1  ;;  %v688_v59 = vadd.f32 %v687_v57, %v686_v54 }
  0xe7   :  { %v689_v60 = vpop.f32.mrf.mxu0  ;;  %v710_v63 = vadd.f32 %v709_v58, %v708_v55 }
  0xe8   :  { %v711_v61 = vpop.f32.mrf.mxu1  ;;  %v341_v62 = vadd.f32 %v688_v59, %v615_v56 }
  0xe9   :  { %v690_v0 = vpop.f32.mrf.mxu0 }
  0xea   :  { %v712_v1 = vpop.f32.mrf.mxu1  ;;  %v381_v2 = vadd.f32 %v710_v63, %v341_v62 }
  0xec   :  { %v386_v3 = vpack.c.bf16 %v381_v2, %v381_v2 }
  0xee   :  { %749 = vmatmul.mubr.bf16.vlgmr.msra.gmra.mxu0 %v386_v3 }
 0x1ae   :  { %v492_v6 = vpop.f32.mrf.mxu0 }
 0x1af   :  { %v493_v7 = vadd.f32 %v652_v5, %v492_v6 }
 0x1b0   :  { %v750_v8 = vpop.f32.mrf.mxu0 }
 0x1b1   :  { %v498_v9 = vpack.c.bf16 %v493_v7, %v493_v7 }
 0x1b2   :  { %v495_v10 = vpop.f32.mrf.mxu0 }
 0x1b3   :  { %769 = vmatmul.mubr.bf16.vlgmr.msra.gmra.mxu1 %v498_v9 }
 0x1b4   :  { %v751_v11 = vpop.f32.mrf.mxu0 }
 0x273   :  { %v604_v13 = vpop.f32.mrf.mxu1 }
 0x274   :  { %v605_v14 = vadd.f32 %v661_v12, %v604_v13 }
 0x275   :  { %v770_v15 = vpop.f32.mrf.mxu1 }
 0x276   :  { %610 = vst [vmem:[%s1037_s7] sm:$0xff] %v605_v14 }
 0x277   :  { %v607_v16 = vpop.f32.mrf.mxu1 }
 0x279   :  { %v771_v17 = vpop.f32.mrf.mxu1 }

</bundles_post_ra>
